<compile_context>
chip_gen: v5e
topology: v5e:2x2
jax: 0.10.0
libtpu: 0.0.40
codegen_flags: <defaults>
</compile_context>

<pallas_src>
import functools

import jax
import jax.numpy as jnp
from jax.experimental import pallas as pl
from jax.experimental.pallas import tpu as pltpu  # noqa: F401  (TPU backend; kept for parity)


def _layernorm(x, gamma, beta, eps=1e-5):
    mu = jnp.mean(x, axis=-1, keepdims=True)
    var = jnp.mean((x - mu) ** 2, axis=-1, keepdims=True)
    return (x - mu) * jax.lax.rsqrt(var + eps) * gamma + beta


def decoder_layer_kernel(nhead, batch, seqlen,
                         q_ref, k_ref, v_ref,
                         wq_ref, wk_ref, wv_ref, bq_ref, bk_ref, bv_ref,
                         wo_ref, bo_ref,
                         g1_ref, be1_ref,
                         w1_ref, b1_ref, w2_ref, b2_ref,
                         g2_ref, be2_ref,
                         x_out_ref, attn_out_ref):
    N, E = q_ref.shape               # N = B * L
    H, B, L = nhead, batch, seqlen
    Dh = E // H
    scale = 1.0 / (Dh ** 0.5)

    q = q_ref[...]                   # (N, E)
    k = k_ref[...]                   # (N, E)
    v = v_ref[...]                   # (N, E)

    attn_acc = jnp.zeros((B, L, L), jnp.float32)
    ctx_proj = jnp.zeros((N, E), jnp.float32)   # sum_h ctx_h @ Wo_h  (replaces concatenate)

    # Static (unrolled) head loop; every per-head access touches only leading dims.
    for h in range(H):
        qh = (jnp.dot(q, wq_ref[h], preferred_element_type=jnp.float32) + bq_ref[h]) * scale
        kh = jnp.dot(k, wk_ref[h], preferred_element_type=jnp.float32) + bk_ref[h]
        vh = jnp.dot(v, wv_ref[h], preferred_element_type=jnp.float32) + bv_ref[h]

        # Leading-dim reshape (free, minor dim untouched): (B*L, Dh) -> (B, L, Dh)
        qh3 = qh.reshape(B, L, Dh)
        kh3 = kh.reshape(B, L, Dh)
        vh3 = vh.reshape(B, L, Dh)

        s = jnp.einsum("bqd,bkd->bqk", qh3, kh3, preferred_element_type=jnp.float32)  # (B,L,L)
        s = s - jnp.max(s, axis=-1, keepdims=True)
        p = jnp.exp(s)
        p = p * pl.reciprocal(jnp.sum(p, axis=-1, keepdims=True), approx=True)
        attn_acc = attn_acc + p

        ctx3 = jnp.einsum("bqk,bkd->bqd", p, vh3, preferred_element_type=jnp.float32)  # (B,L,Dh)
        # Merge heads by accumulating directly into the output projection.
        ctx_proj = ctx_proj + jnp.dot(ctx3.reshape(N, Dh), wo_ref[h],
                                      preferred_element_type=jnp.float32)

    attn_out_ref[...] = attn_acc * (1.0 / H)      # heads-averaged attention weights

    # out-projection bias + residual with K (as in the module) + LN1
    out1 = ctx_proj + bo_ref[...]
    out1 = k + out1
    out1 = _layernorm(out1, g1_ref[...], be1_ref[...])

    # FFN (ReLU); dropout == identity in eval mode
    h1 = jnp.maximum(jnp.dot(out1, w1_ref[...], preferred_element_type=jnp.float32)
                     + b1_ref[...], 0.0)
    out2 = jnp.dot(h1, w2_ref[...], preferred_element_type=jnp.float32) + b2_ref[...]
    out2 = out2 + out2                            # out2 + dropout2(out2), eval mode
    out2 = _layernorm(out2, g2_ref[...], be2_ref[...])
    x_out_ref[...] = out2


def decoder_layer_forward(q_lbe, k_lbe, v_lbe, params, nhead):
    """q, k, v: (L, B, E) seq-first (PyTorch nn.MultiheadAttention convention).

    Returns (x, attn): x is (L, B, E), attn is (B, L, L) heads-averaged."""
    L, B, E = q_lbe.shape
    H = nhead
    Dh = E // H
    N = B * L
    F = params["w1"].shape[1]

    # Plain-JAX glue outside the kernel: batch-major flatten to (B*L, E).
    to2d = lambda t: jnp.transpose(t, (1, 0, 2)).reshape(N, E)
    q2, k2, v2 = to2d(q_lbe), to2d(k_lbe), to2d(v_lbe)

    # Per-head weight/bias slabs (plain JAX, outside the kernel) so the kernel only
    # ever indexes leading dims -- no sub-128-lane slicing or concatenation inside.
    head_w = lambda w: w.reshape(E, H, Dh).transpose(1, 0, 2)     # (H, E, Dh)
    head_b = lambda b: b.reshape(1, H, Dh).transpose(1, 0, 2)     # (H, 1, Dh)
    wq3, wk3, wv3 = head_w(params["wq"]), head_w(params["wk"]), head_w(params["wv"])
    bq3, bk3, bv3 = head_b(params["bq"]), head_b(params["bk"]), head_b(params["bv"])
    wo3 = params["wo"].reshape(H, Dh, E)                          # (H, Dh, E)

    # Advisory cost estimate for XLA's scheduler around the custom call.
    flops = (3 * 2 * N * E * E                 # in-projections (summed over heads)
             + 2 * (2 * B * H * L * L * Dh)    # scores + p@v
             + 2 * N * E * E                   # out-projection
             + 2 * 2 * N * E * F)              # FFN
    transcendentals = B * H * L * L + B * H * L + 2 * N
    bytes_accessed = 4 * (3 * N * E + 4 * E * E + 2 * E * F
                          + 10 * E + F + N * E + B * L * L)
    cost = pl.CostEstimate(flops=flops, transcendentals=transcendentals,
                           bytes_accessed=bytes_accessed)

    out_shape = (
        jax.ShapeDtypeStruct((N, E), jnp.float32),
        jax.ShapeDtypeStruct((B, L, L), jnp.float32),
    )
    # Single gridless invocation: whole-array blocks auto-DMA'd into VMEM.
    x2, attn = pl.pallas_call(
        functools.partial(decoder_layer_kernel, H, B, L),
        out_shape=out_shape,
        cost_estimate=cost,
    )(q2, k2, v2,
      wq3, wk3, wv3, bq3, bk3, bv3,
      wo3, params["bo"],
      params["g1"], params["be1"],
      params["w1"], params["b1"], params["w2"], params["b2"],
      params["g2"], params["be2"])

    x = jnp.transpose(x2.reshape(B, L, E), (1, 0, 2))             # back to (L, B, E)
    return x, attn


def reference_forward(q_lbe, k_lbe, v_lbe, p, nhead):
    """Pure-JAX reference mirroring the PyTorch module in eval mode (seq-first I/O)."""
    L, B, E = q_lbe.shape
    Dh = E // nhead
    q = jnp.transpose(q_lbe, (1, 0, 2))
    k = jnp.transpose(k_lbe, (1, 0, 2))
    v = jnp.transpose(v_lbe, (1, 0, 2))

    qp = q @ p["wq"] + p["bq"]
    kp = k @ p["wk"] + p["bk"]
    vp = v @ p["wv"] + p["bv"]
    split = lambda x: x.reshape(B, L, nhead, Dh).transpose(0, 2, 1, 3)
    qh, kh, vh = split(qp) / jnp.sqrt(Dh), split(kp), split(vp)
    s = jnp.einsum("bhld,bhmd->bhlm", qh, kh)
    pw = jax.nn.softmax(s, axis=-1)
    ctx = jnp.einsum("bhlm,bhmd->bhld", pw, vh).transpose(0, 2, 1, 3).reshape(B, L, E)
    attn = pw.mean(axis=1)

    out1 = ctx @ p["wo"] + p["bo"]
    out1 = k + out1
    out1 = _layernorm(out1, p["g1"], p["be1"])
    h1 = jax.nn.relu(out1 @ p["w1"] + p["b1"])
    out2 = h1 @ p["w2"] + p["b2"]
    out2 = out2 + out2
    out2 = _layernorm(out2, p["g2"], p["be2"])
    return jnp.transpose(out2, (1, 0, 2)), attn


def make_params(key, d_model, dim_feedforward):
    E, F = d_model, dim_feedforward
    ks = jax.random.split(key, 12)
    rnd = lambda k, shape: 0.1 * jax.random.normal(k, shape, jnp.float32)
    return {
        # all linear weights stored pre-transposed as (in, out)
        "wq": rnd(ks[0], (E, E)), "wk": rnd(ks[1], (E, E)), "wv": rnd(ks[2], (E, E)),
        "bq": rnd(ks[3], (1, E)), "bk": rnd(ks[4], (1, E)), "bv": rnd(ks[5], (1, E)),
        "wo": rnd(ks[6], (E, E)), "bo": rnd(ks[7], (1, E)),
        "g1": jnp.ones((1, E), jnp.float32), "be1": jnp.zeros((1, E), jnp.float32),
        "w1": rnd(ks[8], (E, F)), "b1": rnd(ks[9], (1, F)),
        "w2": rnd(ks[10], (F, E)), "b2": rnd(ks[11], (1, E)),
        "g2": jnp.ones((1, E), jnp.float32), "be2": jnp.zeros((1, E), jnp.float32),
    }


if __name__ == "__main__":
    d_model, nhead, dim_feedforward = 32, 4, 64
    B, L = 2, 8

    key = jax.random.PRNGKey(0)
    kq, kk, kv, kp = jax.random.split(key, 4)
    q = jax.random.normal(kq, (L, B, d_model), jnp.float32)   # seq-first, like the module
    k = jax.random.normal(kk, (L, B, d_model), jnp.float32)
    v = jax.random.normal(kv, (L, B, d_model), jnp.float32)
    params = make_params(kp, d_model, dim_feedforward)

    # TODO(synk): src_mask / key_padding_mask paths not implemented (module is called with mask=None).
    x, attn = decoder_layer_forward(q, k, v, params, nhead)
    jax.block_until_ready((x, attn))

    x_ref, attn_ref = reference_forward(q, k, v, params, nhead)
    # approx=True reciprocal in the in-kernel softmax => slightly looser tolerance.
    assert jnp.allclose(x, x_ref, atol=2e-3, rtol=2e-3), "x mismatch vs reference"
    assert jnp.allclose(attn, attn_ref, atol=2e-3, rtol=2e-3), "attn mismatch vs reference"

    print("KERNEL_OK")
</pallas_src>

<mosaic_0001>
module attributes {stable_mosaic.version = 11 : i64} {
  func.func @decoder_layer_kernel(%arg0: memref<16x32xf32, #tpu.memory_space<vmem>>, %arg1: memref<16x32xf32, #tpu.memory_space<vmem>>, %arg2: memref<16x32xf32, #tpu.memory_space<vmem>>, %arg3: memref<4x32x8xf32, #tpu.memory_space<vmem>>, %arg4: memref<4x32x8xf32, #tpu.memory_space<vmem>>, %arg5: memref<4x32x8xf32, #tpu.memory_space<vmem>>, %arg6: memref<4x1x8xf32, #tpu.memory_space<vmem>>, %arg7: memref<4x1x8xf32, #tpu.memory_space<vmem>>, %arg8: memref<4x1x8xf32, #tpu.memory_space<vmem>>, %arg9: memref<4x8x32xf32, #tpu.memory_space<vmem>>, %arg10: memref<1x32xf32, #tpu.memory_space<vmem>>, %arg11: memref<1x32xf32, #tpu.memory_space<vmem>>, %arg12: memref<1x32xf32, #tpu.memory_space<vmem>>, %arg13: memref<32x64xf32, #tpu.memory_space<vmem>>, %arg14: memref<1x64xf32, #tpu.memory_space<vmem>>, %arg15: memref<64x32xf32, #tpu.memory_space<vmem>>, %arg16: memref<1x32xf32, #tpu.memory_space<vmem>>, %arg17: memref<1x32xf32, #tpu.memory_space<vmem>>, %arg18: memref<1x32xf32, #tpu.memory_space<vmem>>, %arg19: memref<16x32xf32, #tpu.memory_space<vmem>>, %arg20: memref<2x8x8xf32, #tpu.memory_space<vmem>>) attributes {dimension_semantics = [], scalar_prefetch = 0 : i64, scratch_operands = 0 : i64, tpu.core_type = #tpu.core_type<tc>} {
    %c0 = arith.constant 0 : index
    %c0_0 = arith.constant 0 : index
    %0 = vector.load %arg0[%c0, %c0_0] : memref<16x32xf32, #tpu.memory_space<vmem>>, vector<16x32xf32>
    %c0_1 = arith.constant 0 : index
    %c0_2 = arith.constant 0 : index
    %1 = vector.load %arg1[%c0_1, %c0_2] : memref<16x32xf32, #tpu.memory_space<vmem>>, vector<16x32xf32>
    %c0_3 = arith.constant 0 : index
    %c0_4 = arith.constant 0 : index
    %2 = vector.load %arg2[%c0_3, %c0_4] : memref<16x32xf32, #tpu.memory_space<vmem>>, vector<16x32xf32>
    %cst = arith.constant 0.000000e+00 : f32
    %3 = vector.broadcast %cst : f32 to vector<2x8x8xf32>
    %cst_5 = arith.constant 0.000000e+00 : f32
    %4 = vector.broadcast %cst_5 : f32 to vector<16x32xf32>
    %c0_6 = arith.constant 0 : index
    %c0_7 = arith.constant 0 : index
    %c0_8 = arith.constant 0 : index
    %5 = vector.load %arg3[%c0_6, %c0_7, %c0_8] : memref<4x32x8xf32, #tpu.memory_space<vmem>>, vector<1x32x8xf32>
    %6 = vector.shape_cast %5 : vector<1x32x8xf32> to vector<32x8xf32>
    %cst_9 = arith.constant dense<0.000000e+00> : vector<16x8xf32>
    %7 = tpu.matmul %0, %6, %cst_9 {dimension_numbers = #tpu.dot_dimension_numbers<[1], [0], [0], [1], [0, 0, 1, 1], [], []>} : vector<16x32xf32>, vector<32x8xf32>, vector<16x8xf32> -> vector<16x8xf32>
    %c0_10 = arith.constant 0 : index
    %c0_11 = arith.constant 0 : index
    %c0_12 = arith.constant 0 : index
    %8 = vector.load %arg6[%c0_10, %c0_11, %c0_12] : memref<4x1x8xf32, #tpu.memory_space<vmem>>, vector<1x1x8xf32>
    %9 = vector.shape_cast %8 : vector<1x1x8xf32> to vector<1x8xf32>
    %10 = vector.broadcast %9 : vector<1x8xf32> to vector<16x8xf32>
    %11 = arith.addf %7, %10 : vector<16x8xf32>
    %cst_13 = arith.constant 0.353553385 : f32
    %12 = vector.broadcast %cst_13 : f32 to vector<16x8xf32>
    %13 = arith.mulf %11, %12 : vector<16x8xf32>
    %c0_14 = arith.constant 0 : index
    %c0_15 = arith.constant 0 : index
    %c0_16 = arith.constant 0 : index
    %14 = vector.load %arg4[%c0_14, %c0_15, %c0_16] : memref<4x32x8xf32, #tpu.memory_space<vmem>>, vector<1x32x8xf32>
    %15 = vector.shape_cast %14 : vector<1x32x8xf32> to vector<32x8xf32>
    %cst_17 = arith.constant dense<0.000000e+00> : vector<16x8xf32>
    %16 = tpu.matmul %1, %15, %cst_17 {dimension_numbers = #tpu.dot_dimension_numbers<[1], [0], [0], [1], [0, 0, 1, 1], [], []>} : vector<16x32xf32>, vector<32x8xf32>, vector<16x8xf32> -> vector<16x8xf32>
    %c0_18 = arith.constant 0 : index
    %c0_19 = arith.constant 0 : index
    %c0_20 = arith.constant 0 : index
    %17 = vector.load %arg7[%c0_18, %c0_19, %c0_20] : memref<4x1x8xf32, #tpu.memory_space<vmem>>, vector<1x1x8xf32>
    %18 = vector.shape_cast %17 : vector<1x1x8xf32> to vector<1x8xf32>
    %19 = vector.broadcast %18 : vector<1x8xf32> to vector<16x8xf32>
    %20 = arith.addf %16, %19 : vector<16x8xf32>
    %c0_21 = arith.constant 0 : index
    %c0_22 = arith.constant 0 : index
    %c0_23 = arith.constant 0 : index
    %21 = vector.load %arg5[%c0_21, %c0_22, %c0_23] : memref<4x32x8xf32, #tpu.memory_space<vmem>>, vector<1x32x8xf32>
    %22 = vector.shape_cast %21 : vector<1x32x8xf32> to vector<32x8xf32>
    %cst_24 = arith.constant dense<0.000000e+00> : vector<16x8xf32>
    %23 = tpu.matmul %2, %22, %cst_24 {dimension_numbers = #tpu.dot_dimension_numbers<[1], [0], [0], [1], [0, 0, 1, 1], [], []>} : vector<16x32xf32>, vector<32x8xf32>, vector<16x8xf32> -> vector<16x8xf32>
    %c0_25 = arith.constant 0 : index
    %c0_26 = arith.constant 0 : index
    %c0_27 = arith.constant 0 : index
    %24 = vector.load %arg8[%c0_25, %c0_26, %c0_27] : memref<4x1x8xf32, #tpu.memory_space<vmem>>, vector<1x1x8xf32>
    %25 = vector.shape_cast %24 : vector<1x1x8xf32> to vector<1x8xf32>
    %26 = vector.broadcast %25 : vector<1x8xf32> to vector<16x8xf32>
    %27 = arith.addf %23, %26 : vector<16x8xf32>
    %28 = vector.shape_cast %13 : vector<16x8xf32> to vector<2x8x8xf32>
    %29 = vector.shape_cast %20 : vector<16x8xf32> to vector<2x8x8xf32>
    %30 = vector.shape_cast %27 : vector<16x8xf32> to vector<2x8x8xf32>
    "tpu.trace_start"() <{level = 10 : i32, message = "bqd,bkd->bqk"}> : () -> ()
    %cst_28 = arith.constant dense<0.000000e+00> : vector<2x8x8xf32>
    %31 = tpu.matmul %28, %29, %cst_28 {dimension_numbers = #tpu.dot_dimension_numbers<[2], [2], [1], [1], [0, 0, 0, 1, 1, 1], [0], [0]>} : vector<2x8x8xf32>, vector<2x8x8xf32>, vector<2x8x8xf32> -> vector<2x8x8xf32>
    "tpu.trace_stop"() : () -> ()
    %cst_29 = arith.constant dense<0xFF800000> : vector<2x8xf32>
    %32 = vector.multi_reduction <maximumf>, %31, %cst_29 [2] : vector<2x8x8xf32> to vector<2x8xf32>
    %33 = vector.shape_cast %32 : vector<2x8xf32> to vector<2x8x1xf32>
    %34 = vector.broadcast %33 : vector<2x8x1xf32> to vector<2x8x8xf32>
    %35 = arith.subf %31, %34 : vector<2x8x8xf32>
    %36 = math.exp %35 : vector<2x8x8xf32>
    %cst_30 = arith.constant dense<0.000000e+00> : vector<2x8xf32>
    %37 = vector.multi_reduction <add>, %36, %cst_30 [2] : vector<2x8x8xf32> to vector<2x8xf32>
    %38 = vector.shape_cast %37 : vector<2x8xf32> to vector<2x8x1xf32>
    %39 = tpu.reciprocal %38 {approx = true} : vector<2x8x1xf32> -> vector<2x8x1xf32>
    %40 = vector.broadcast %39 : vector<2x8x1xf32> to vector<2x8x8xf32>
    %41 = arith.mulf %36, %40 : vector<2x8x8xf32>
    %42 = arith.addf %3, %41 : vector<2x8x8xf32>
    "tpu.trace_start"() <{level = 10 : i32, message = "bqk,bkd->bqd"}> : () -> ()
    %cst_31 = arith.constant dense<0.000000e+00> : vector<2x8x8xf32>
    %43 = tpu.matmul %41, %30, %cst_31 {dimension_numbers = #tpu.dot_dimension_numbers<[2], [1], [1], [2], [0, 0, 0, 1, 1, 2], [0], [0]>} : vector<2x8x8xf32>, vector<2x8x8xf32>, vector<2x8x8xf32> -> vector<2x8x8xf32>
    "tpu.trace_stop"() : () -> ()
    %44 = vector.shape_cast %43 : vector<2x8x8xf32> to vector<16x8xf32>
    %c0_32 = arith.constant 0 : index
    %c0_33 = arith.constant 0 : index
    %c0_34 = arith.constant 0 : index
    %45 = vector.load %arg9[%c0_32, %c0_33, %c0_34] : memref<4x8x32xf32, #tpu.memory_space<vmem>>, vector<1x8x32xf32>
    %46 = vector.shape_cast %45 : vector<1x8x32xf32> to vector<8x32xf32>
    %cst_35 = arith.constant dense<0.000000e+00> : vector<16x32xf32>
    %47 = tpu.matmul %44, %46, %cst_35 {dimension_numbers = #tpu.dot_dimension_numbers<[1], [0], [0], [1], [0, 0, 1, 1], [], []>} : vector<16x8xf32>, vector<8x32xf32>, vector<16x32xf32> -> vector<16x32xf32>
    %48 = arith.addf %4, %47 : vector<16x32xf32>
    %c1 = arith.constant 1 : index
    %c0_36 = arith.constant 0 : index
    %c0_37 = arith.constant 0 : index
    %49 = vector.load %arg3[%c1, %c0_36, %c0_37] : memref<4x32x8xf32, #tpu.memory_space<vmem>>, vector<1x32x8xf32>
    %50 = vector.shape_cast %49 : vector<1x32x8xf32> to vector<32x8xf32>
    %cst_38 = arith.constant dense<0.000000e+00> : vector<16x8xf32>
    %51 = tpu.matmul %0, %50, %cst_38 {dimension_numbers = #tpu.dot_dimension_numbers<[1], [0], [0], [1], [0, 0, 1, 1], [], []>} : vector<16x32xf32>, vector<32x8xf32>, vector<16x8xf32> -> vector<16x8xf32>
    %c1_39 = arith.constant 1 : index
    %c0_40 = arith.constant 0 : index
    %c0_41 = arith.constant 0 : index
    %52 = vector.load %arg6[%c1_39, %c0_40, %c0_41] : memref<4x1x8xf32, #tpu.memory_space<vmem>>, vector<1x1x8xf32>
    %53 = vector.shape_cast %52 : vector<1x1x8xf32> to vector<1x8xf32>
    %54 = vector.broadcast %53 : vector<1x8xf32> to vector<16x8xf32>
    %55 = arith.addf %51, %54 : vector<16x8xf32>
    %cst_42 = arith.constant 0.353553385 : f32
    %56 = vector.broadcast %cst_42 : f32 to vector<16x8xf32>
    %57 = arith.mulf %55, %56 : vector<16x8xf32>
    %c1_43 = arith.constant 1 : index
    %c0_44 = arith.constant 0 : index
    %c0_45 = arith.constant 0 : index
    %58 = vector.load %arg4[%c1_43, %c0_44, %c0_45] : memref<4x32x8xf32, #tpu.memory_space<vmem>>, vector<1x32x8xf32>
    %59 = vector.shape_cast %58 : vector<1x32x8xf32> to vector<32x8xf32>
    %cst_46 = arith.constant dense<0.000000e+00> : vector<16x8xf32>
    %60 = tpu.matmul %1, %59, %cst_46 {dimension_numbers = #tpu.dot_dimension_numbers<[1], [0], [0], [1], [0, 0, 1, 1], [], []>} : vector<16x32xf32>, vector<32x8xf32>, vector<16x8xf32> -> vector<16x8xf32>
    %c1_47 = arith.constant 1 : index
    %c0_48 = arith.constant 0 : index
    %c0_49 = arith.constant 0 : index
    %61 = vector.load %arg7[%c1_47, %c0_48, %c0_49] : memref<4x1x8xf32, #tpu.memory_space<vmem>>, vector<1x1x8xf32>
    %62 = vector.shape_cast %61 : vector<1x1x8xf32> to vector<1x8xf32>
    %63 = vector.broadcast %62 : vector<1x8xf32> to vector<16x8xf32>
    %64 = arith.addf %60, %63 : vector<16x8xf32>
    %c1_50 = arith.constant 1 : index
    %c0_51 = arith.constant 0 : index
    %c0_52 = arith.constant 0 : index
    %65 = vector.load %arg5[%c1_50, %c0_51, %c0_52] : memref<4x32x8xf32, #tpu.memory_space<vmem>>, vector<1x32x8xf32>
    %66 = vector.shape_cast %65 : vector<1x32x8xf32> to vector<32x8xf32>
    %cst_53 = arith.constant dense<0.000000e+00> : vector<16x8xf32>
    %67 = tpu.matmul %2, %66, %cst_53 {dimension_numbers = #tpu.dot_dimension_numbers<[1], [0], [0], [1], [0, 0, 1, 1], [], []>} : vector<16x32xf32>, vector<32x8xf32>, vector<16x8xf32> -> vector<16x8xf32>
    %c1_54 = arith.constant 1 : index
    %c0_55 = arith.constant 0 : index
    %c0_56 = arith.constant 0 : index
    %68 = vector.load %arg8[%c1_54, %c0_55, %c0_56] : memref<4x1x8xf32, #tpu.memory_space<vmem>>, vector<1x1x8xf32>
    %69 = vector.shape_cast %68 : vector<1x1x8xf32> to vector<1x8xf32>
    %70 = vector.broadcast %69 : vector<1x8xf32> to vector<16x8xf32>
    %71 = arith.addf %67, %70 : vector<16x8xf32>
    %72 = vector.shape_cast %57 : vector<16x8xf32> to vector<2x8x8xf32>
    %73 = vector.shape_cast %64 : vector<16x8xf32> to vector<2x8x8xf32>
    %74 = vector.shape_cast %71 : vector<16x8xf32> to vector<2x8x8xf32>
    "tpu.trace_start"() <{level = 10 : i32, message = "bqd,bkd->bqk"}> : () -> ()
    %cst_57 = arith.constant dense<0.000000e+00> : vector<2x8x8xf32>
    %75 = tpu.matmul %72, %73, %cst_57 {dimension_numbers = #tpu.dot_dimension_numbers<[2], [2], [1], [1], [0, 0, 0, 1, 1, 1], [0], [0]>} : vector<2x8x8xf32>, vector<2x8x8xf32>, vector<2x8x8xf32> -> vector<2x8x8xf32>
    "tpu.trace_stop"() : () -> ()
    %cst_58 = arith.constant dense<0xFF800000> : vector<2x8xf32>
    %76 = vector.multi_reduction <maximumf>, %75, %cst_58 [2] : vector<2x8x8xf32> to vector<2x8xf32>
    %77 = vector.shape_cast %76 : vector<2x8xf32> to vector<2x8x1xf32>
    %78 = vector.broadcast %77 : vector<2x8x1xf32> to vector<2x8x8xf32>
    %79 = arith.subf %75, %78 : vector<2x8x8xf32>
    %80 = math.exp %79 : vector<2x8x8xf32>
    %cst_59 = arith.constant dense<0.000000e+00> : vector<2x8xf32>
    %81 = vector.multi_reduction <add>, %80, %cst_59 [2] : vector<2x8x8xf32> to vector<2x8xf32>
    %82 = vector.shape_cast %81 : vector<2x8xf32> to vector<2x8x1xf32>
    %83 = tpu.reciprocal %82 {approx = true} : vector<2x8x1xf32> -> vector<2x8x1xf32>
    %84 = vector.broadcast %83 : vector<2x8x1xf32> to vector<2x8x8xf32>
    %85 = arith.mulf %80, %84 : vector<2x8x8xf32>
    %86 = arith.addf %42, %85 : vector<2x8x8xf32>
    "tpu.trace_start"() <{level = 10 : i32, message = "bqk,bkd->bqd"}> : () -> ()
    %cst_60 = arith.constant dense<0.000000e+00> : vector<2x8x8xf32>
    %87 = tpu.matmul %85, %74, %cst_60 {dimension_numbers = #tpu.dot_dimension_numbers<[2], [1], [1], [2], [0, 0, 0, 1, 1, 2], [0], [0]>} : vector<2x8x8xf32>, vector<2x8x8xf32>, vector<2x8x8xf32> -> vector<2x8x8xf32>
    "tpu.trace_stop"() : () -> ()
    %88 = vector.shape_cast %87 : vector<2x8x8xf32> to vector<16x8xf32>
    %c1_61 = arith.constant 1 : index
    %c0_62 = arith.constant 0 : index
    %c0_63 = arith.constant 0 : index
    %89 = vector.load %arg9[%c1_61, %c0_62, %c0_63] : memref<4x8x32xf32, #tpu.memory_space<vmem>>, vector<1x8x32xf32>
    %90 = vector.shape_cast %89 : vector<1x8x32xf32> to vector<8x32xf32>
    %cst_64 = arith.constant dense<0.000000e+00> : vector<16x32xf32>
    %91 = tpu.matmul %88, %90, %cst_64 {dimension_numbers = #tpu.dot_dimension_numbers<[1], [0], [0], [1], [0, 0, 1, 1], [], []>} : vector<16x8xf32>, vector<8x32xf32>, vector<16x32xf32> -> vector<16x32xf32>
    %92 = arith.addf %48, %91 : vector<16x32xf32>
    %c2 = arith.constant 2 : index
    %c0_65 = arith.constant 0 : index
    %c0_66 = arith.constant 0 : index
    %93 = vector.load %arg3[%c2, %c0_65, %c0_66] : memref<4x32x8xf32, #tpu.memory_space<vmem>>, vector<1x32x8xf32>
    %94 = vector.shape_cast %93 : vector<1x32x8xf32> to vector<32x8xf32>
    %cst_67 = arith.constant dense<0.000000e+00> : vector<16x8xf32>
    %95 = tpu.matmul %0, %94, %cst_67 {dimension_numbers = #tpu.dot_dimension_numbers<[1], [0], [0], [1], [0, 0, 1, 1], [], []>} : vector<16x32xf32>, vector<32x8xf32>, vector<16x8xf32> -> vector<16x8xf32>
    %c2_68 = arith.constant 2 : index
    %c0_69 = arith.constant 0 : index
    %c0_70 = arith.constant 0 : index
    %96 = vector.load %arg6[%c2_68, %c0_69, %c0_70] : memref<4x1x8xf32, #tpu.memory_space<vmem>>, vector<1x1x8xf32>
    %97 = vector.shape_cast %96 : vector<1x1x8xf32> to vector<1x8xf32>
    %98 = vector.broadcast %97 : vector<1x8xf32> to vector<16x8xf32>
    %99 = arith.addf %95, %98 : vector<16x8xf32>
    %cst_71 = arith.constant 0.353553385 : f32
    %100 = vector.broadcast %cst_71 : f32 to vector<16x8xf32>
    %101 = arith.mulf %99, %100 : vector<16x8xf32>
    %c2_72 = arith.constant 2 : index
    %c0_73 = arith.constant 0 : index
    %c0_74 = arith.constant 0 : index
    %102 = vector.load %arg4[%c2_72, %c0_73, %c0_74] : memref<4x32x8xf32, #tpu.memory_space<vmem>>, vector<1x32x8xf32>
    %103 = vector.shape_cast %102 : vector<1x32x8xf32> to vector<32x8xf32>
    %cst_75 = arith.constant dense<0.000000e+00> : vector<16x8xf32>
    %104 = tpu.matmul %1, %103, %cst_75 {dimension_numbers = #tpu.dot_dimension_numbers<[1], [0], [0], [1], [0, 0, 1, 1], [], []>} : vector<16x32xf32>, vector<32x8xf32>, vector<16x8xf32> -> vector<16x8xf32>
    %c2_76 = arith.constant 2 : index
    %c0_77 = arith.constant 0 : index
    %c0_78 = arith.constant 0 : index
    %105 = vector.load %arg7[%c2_76, %c0_77, %c0_78] : memref<4x1x8xf32, #tpu.memory_space<vmem>>, vector<1x1x8xf32>
    %106 = vector.shape_cast %105 : vector<1x1x8xf32> to vector<1x8xf32>
    %107 = vector.broadcast %106 : vector<1x8xf32> to vector<16x8xf32>
    %108 = arith.addf %104, %107 : vector<16x8xf32>
    %c2_79 = arith.constant 2 : index
    %c0_80 = arith.constant 0 : index
    %c0_81 = arith.constant 0 : index
    %109 = vector.load %arg5[%c2_79, %c0_80, %c0_81] : memref<4x32x8xf32, #tpu.memory_space<vmem>>, vector<1x32x8xf32>
    %110 = vector.shape_cast %109 : vector<1x32x8xf32> to vector<32x8xf32>
    %cst_82 = arith.constant dense<0.000000e+00> : vector<16x8xf32>
    %111 = tpu.matmul %2, %110, %cst_82 {dimension_numbers = #tpu.dot_dimension_numbers<[1], [0], [0], [1], [0, 0, 1, 1], [], []>} : vector<16x32xf32>, vector<32x8xf32>, vector<16x8xf32> -> vector<16x8xf32>
    %c2_83 = arith.constant 2 : index
    %c0_84 = arith.constant 0 : index
    %c0_85 = arith.constant 0 : index
    %112 = vector.load %arg8[%c2_83, %c0_84, %c0_85] : memref<4x1x8xf32, #tpu.memory_space<vmem>>, vector<1x1x8xf32>
    %113 = vector.shape_cast %112 : vector<1x1x8xf32> to vector<1x8xf32>
    %114 = vector.broadcast %113 : vector<1x8xf32> to vector<16x8xf32>
    %115 = arith.addf %111, %114 : vector<16x8xf32>
    %116 = vector.shape_cast %101 : vector<16x8xf32> to vector<2x8x8xf32>
    %117 = vector.shape_cast %108 : vector<16x8xf32> to vector<2x8x8xf32>
    %118 = vector.shape_cast %115 : vector<16x8xf32> to vector<2x8x8xf32>
    "tpu.trace_start"() <{level = 10 : i32, message = "bqd,bkd->bqk"}> : () -> ()
    %cst_86 = arith.constant dense<0.000000e+00> : vector<2x8x8xf32>
    %119 = tpu.matmul %116, %117, %cst_86 {dimension_numbers = #tpu.dot_dimension_numbers<[2], [2], [1], [1], [0, 0, 0, 1, 1, 1], [0], [0]>} : vector<2x8x8xf32>, vector<2x8x8xf32>, vector<2x8x8xf32> -> vector<2x8x8xf32>
    "tpu.trace_stop"() : () -> ()
    %cst_87 = arith.constant dense<0xFF800000> : vector<2x8xf32>
    %120 = vector.multi_reduction <maximumf>, %119, %cst_87 [2] : vector<2x8x8xf32> to vector<2x8xf32>
    %121 = vector.shape_cast %120 : vector<2x8xf32> to vector<2x8x1xf32>
    %122 = vector.broadcast %121 : vector<2x8x1xf32> to vector<2x8x8xf32>
    %123 = arith.subf %119, %122 : vector<2x8x8xf32>
    %124 = math.exp %123 : vector<2x8x8xf32>
    %cst_88 = arith.constant dense<0.000000e+00> : vector<2x8xf32>
    %125 = vector.multi_reduction <add>, %124, %cst_88 [2] : vector<2x8x8xf32> to vector<2x8xf32>
    %126 = vector.shape_cast %125 : vector<2x8xf32> to vector<2x8x1xf32>
    %127 = tpu.reciprocal %126 {approx = true} : vector<2x8x1xf32> -> vector<2x8x1xf32>
    %128 = vector.broadcast %127 : vector<2x8x1xf32> to vector<2x8x8xf32>
    %129 = arith.mulf %124, %128 : vector<2x8x8xf32>
    %130 = arith.addf %86, %129 : vector<2x8x8xf32>
    "tpu.trace_start"() <{level = 10 : i32, message = "bqk,bkd->bqd"}> : () -> ()
    %cst_89 = arith.constant dense<0.000000e+00> : vector<2x8x8xf32>
    %131 = tpu.matmul %129, %118, %cst_89 {dimension_numbers = #tpu.dot_dimension_numbers<[2], [1], [1], [2], [0, 0, 0, 1, 1, 2], [0], [0]>} : vector<2x8x8xf32>, vector<2x8x8xf32>, vector<2x8x8xf32> -> vector<2x8x8xf32>
    "tpu.trace_stop"() : () -> ()
    %132 = vector.shape_cast %131 : vector<2x8x8xf32> to vector<16x8xf32>
    %c2_90 = arith.constant 2 : index
    %c0_91 = arith.constant 0 : index
    %c0_92 = arith.constant 0 : index
    %133 = vector.load %arg9[%c2_90, %c0_91, %c0_92] : memref<4x8x32xf32, #tpu.memory_space<vmem>>, vector<1x8x32xf32>
    %134 = vector.shape_cast %133 : vector<1x8x32xf32> to vector<8x32xf32>
    %cst_93 = arith.constant dense<0.000000e+00> : vector<16x32xf32>
    %135 = tpu.matmul %132, %134, %cst_93 {dimension_numbers = #tpu.dot_dimension_numbers<[1], [0], [0], [1], [0, 0, 1, 1], [], []>} : vector<16x8xf32>, vector<8x32xf32>, vector<16x32xf32> -> vector<16x32xf32>
    %136 = arith.addf %92, %135 : vector<16x32xf32>
    %c3 = arith.constant 3 : index
    %c0_94 = arith.constant 0 : index
    %c0_95 = arith.constant 0 : index
    %137 = vector.load %arg3[%c3, %c0_94, %c0_95] : memref<4x32x8xf32, #tpu.memory_space<vmem>>, vector<1x32x8xf32>
    %138 = vector.shape_cast %137 : vector<1x32x8xf32> to vector<32x8xf32>
    %cst_96 = arith.constant dense<0.000000e+00> : vector<16x8xf32>
    %139 = tpu.matmul %0, %138, %cst_96 {dimension_numbers = #tpu.dot_dimension_numbers<[1], [0], [0], [1], [0, 0, 1, 1], [], []>} : vector<16x32xf32>, vector<32x8xf32>, vector<16x8xf32> -> vector<16x8xf32>
    %c3_97 = arith.constant 3 : index
    %c0_98 = arith.constant 0 : index
    %c0_99 = arith.constant 0 : index
    %140 = vector.load %arg6[%c3_97, %c0_98, %c0_99] : memref<4x1x8xf32, #tpu.memory_space<vmem>>, vector<1x1x8xf32>
    %141 = vector.shape_cast %140 : vector<1x1x8xf32> to vector<1x8xf32>
    %142 = vector.broadcast %141 : vector<1x8xf32> to vector<16x8xf32>
    %143 = arith.addf %139, %142 : vector<16x8xf32>
    %cst_100 = arith.constant 0.353553385 : f32
    %144 = vector.broadcast %cst_100 : f32 to vector<16x8xf32>
    %145 = arith.mulf %143, %144 : vector<16x8xf32>
    %c3_101 = arith.constant 3 : index
    %c0_102 = arith.constant 0 : index
    %c0_103 = arith.constant 0 : index
    %146 = vector.load %arg4[%c3_101, %c0_102, %c0_103] : memref<4x32x8xf32, #tpu.memory_space<vmem>>, vector<1x32x8xf32>
    %147 = vector.shape_cast %146 : vector<1x32x8xf32> to vector<32x8xf32>
    %cst_104 = arith.constant dense<0.000000e+00> : vector<16x8xf32>
    %148 = tpu.matmul %1, %147, %cst_104 {dimension_numbers = #tpu.dot_dimension_numbers<[1], [0], [0], [1], [0, 0, 1, 1], [], []>} : vector<16x32xf32>, vector<32x8xf32>, vector<16x8xf32> -> vector<16x8xf32>
    %c3_105 = arith.constant 3 : index
    %c0_106 = arith.constant 0 : index
    %c0_107 = arith.constant 0 : index
    %149 = vector.load %arg7[%c3_105, %c0_106, %c0_107] : memref<4x1x8xf32, #tpu.memory_space<vmem>>, vector<1x1x8xf32>
    %150 = vector.shape_cast %149 : vector<1x1x8xf32> to vector<1x8xf32>
    %151 = vector.broadcast %150 : vector<1x8xf32> to vector<16x8xf32>
    %152 = arith.addf %148, %151 : vector<16x8xf32>
    %c3_108 = arith.constant 3 : index
    %c0_109 = arith.constant 0 : index
    %c0_110 = arith.constant 0 : index
    %153 = vector.load %arg5[%c3_108, %c0_109, %c0_110] : memref<4x32x8xf32, #tpu.memory_space<vmem>>, vector<1x32x8xf32>
    %154 = vector.shape_cast %153 : vector<1x32x8xf32> to vector<32x8xf32>
    %cst_111 = arith.constant dense<0.000000e+00> : vector<16x8xf32>
    %155 = tpu.matmul %2, %154, %cst_111 {dimension_numbers = #tpu.dot_dimension_numbers<[1], [0], [0], [1], [0, 0, 1, 1], [], []>} : vector<16x32xf32>, vector<32x8xf32>, vector<16x8xf32> -> vector<16x8xf32>
    %c3_112 = arith.constant 3 : index
    %c0_113 = arith.constant 0 : index
    %c0_114 = arith.constant 0 : index
    %156 = vector.load %arg8[%c3_112, %c0_113, %c0_114] : memref<4x1x8xf32, #tpu.memory_space<vmem>>, vector<1x1x8xf32>
    %157 = vector.shape_cast %156 : vector<1x1x8xf32> to vector<1x8xf32>
    %158 = vector.broadcast %157 : vector<1x8xf32> to vector<16x8xf32>
    %159 = arith.addf %155, %158 : vector<16x8xf32>
    %160 = vector.shape_cast %145 : vector<16x8xf32> to vector<2x8x8xf32>
    %161 = vector.shape_cast %152 : vector<16x8xf32> to vector<2x8x8xf32>
    %162 = vector.shape_cast %159 : vector<16x8xf32> to vector<2x8x8xf32>
    "tpu.trace_start"() <{level = 10 : i32, message = "bqd,bkd->bqk"}> : () -> ()
    %cst_115 = arith.constant dense<0.000000e+00> : vector<2x8x8xf32>
    %163 = tpu.matmul %160, %161, %cst_115 {dimension_numbers = #tpu.dot_dimension_numbers<[2], [2], [1], [1], [0, 0, 0, 1, 1, 1], [0], [0]>} : vector<2x8x8xf32>, vector<2x8x8xf32>, vector<2x8x8xf32> -> vector<2x8x8xf32>
    "tpu.trace_stop"() : () -> ()
    %cst_116 = arith.constant dense<0xFF800000> : vector<2x8xf32>
    %164 = vector.multi_reduction <maximumf>, %163, %cst_116 [2] : vector<2x8x8xf32> to vector<2x8xf32>
    %165 = vector.shape_cast %164 : vector<2x8xf32> to vector<2x8x1xf32>
    %166 = vector.broadcast %165 : vector<2x8x1xf32> to vector<2x8x8xf32>
    %167 = arith.subf %163, %166 : vector<2x8x8xf32>
    %168 = math.exp %167 : vector<2x8x8xf32>
    %cst_117 = arith.constant dense<0.000000e+00> : vector<2x8xf32>
    %169 = vector.multi_reduction <add>, %168, %cst_117 [2] : vector<2x8x8xf32> to vector<2x8xf32>
    %170 = vector.shape_cast %169 : vector<2x8xf32> to vector<2x8x1xf32>
    %171 = tpu.reciprocal %170 {approx = true} : vector<2x8x1xf32> -> vector<2x8x1xf32>
    %172 = vector.broadcast %171 : vector<2x8x1xf32> to vector<2x8x8xf32>
    %173 = arith.mulf %168, %172 : vector<2x8x8xf32>
    %174 = arith.addf %130, %173 : vector<2x8x8xf32>
    "tpu.trace_start"() <{level = 10 : i32, message = "bqk,bkd->bqd"}> : () -> ()
    %cst_118 = arith.constant dense<0.000000e+00> : vector<2x8x8xf32>
    %175 = tpu.matmul %173, %162, %cst_118 {dimension_numbers = #tpu.dot_dimension_numbers<[2], [1], [1], [2], [0, 0, 0, 1, 1, 2], [0], [0]>} : vector<2x8x8xf32>, vector<2x8x8xf32>, vector<2x8x8xf32> -> vector<2x8x8xf32>
    "tpu.trace_stop"() : () -> ()
    %176 = vector.shape_cast %175 : vector<2x8x8xf32> to vector<16x8xf32>
    %c3_119 = arith.constant 3 : index
    %c0_120 = arith.constant 0 : index
    %c0_121 = arith.constant 0 : index
    %177 = vector.load %arg9[%c3_119, %c0_120, %c0_121] : memref<4x8x32xf32, #tpu.memory_space<vmem>>, vector<1x8x32xf32>
    %178 = vector.shape_cast %177 : vector<1x8x32xf32> to vector<8x32xf32>
    %cst_122 = arith.constant dense<0.000000e+00> : vector<16x32xf32>
    %179 = tpu.matmul %176, %178, %cst_122 {dimension_numbers = #tpu.dot_dimension_numbers<[1], [0], [0], [1], [0, 0, 1, 1], [], []>} : vector<16x8xf32>, vector<8x32xf32>, vector<16x32xf32> -> vector<16x32xf32>
    %180 = arith.addf %136, %179 : vector<16x32xf32>
    %cst_123 = arith.constant 2.500000e-01 : f32
    %181 = vector.broadcast %cst_123 : f32 to vector<2x8x8xf32>
    %182 = arith.mulf %174, %181 : vector<2x8x8xf32>
    %c0_124 = arith.constant 0 : index
    %c0_125 = arith.constant 0 : index
    %c0_126 = arith.constant 0 : index
    %183 = vector.load %arg20[%c0_124, %c0_125, %c0_126] : memref<2x8x8xf32, #tpu.memory_space<vmem>>, vector<2x8x8xf32>
    tpu.vector_store %arg20[%c0_124, %c0_125, %c0_126], %182 {strides = array<i32>} : memref<2x8x8xf32, #tpu.memory_space<vmem>>, vector<2x8x8xf32>,
    %c0_127 = arith.constant 0 : index
    %c0_128 = arith.constant 0 : index
    %184 = vector.load %arg10[%c0_127, %c0_128] : memref<1x32xf32, #tpu.memory_space<vmem>>, vector<1x32xf32>
    %185 = vector.broadcast %184 : vector<1x32xf32> to vector<16x32xf32>
    %186 = arith.addf %180, %185 : vector<16x32xf32>
    %187 = arith.addf %1, %186 : vector<16x32xf32>
    %c0_129 = arith.constant 0 : index
    %c0_130 = arith.constant 0 : index
    %188 = vector.load %arg11[%c0_129, %c0_130] : memref<1x32xf32, #tpu.memory_space<vmem>>, vector<1x32xf32>
    %c0_131 = arith.constant 0 : index
    %c0_132 = arith.constant 0 : index
    %189 = vector.load %arg12[%c0_131, %c0_132] : memref<1x32xf32, #tpu.memory_space<vmem>>, vector<1x32xf32>
    %cst_133 = arith.constant dense<0.000000e+00> : vector<16xf32>
    %190 = vector.multi_reduction <add>, %187, %cst_133 [1] : vector<16x32xf32> to vector<16xf32>
    %191 = vector.shape_cast %190 : vector<16xf32> to vector<16x1xf32>
    %cst_134 = arith.constant 3.200000e+01 : f32
    %192 = vector.broadcast %cst_134 : f32 to vector<16x1xf32>
    %193 = arith.divf %191, %192 : vector<16x1xf32>
    %194 = vector.broadcast %193 : vector<16x1xf32> to vector<16x32xf32>
    %195 = arith.subf %187, %194 : vector<16x32xf32>
    %196 = arith.mulf %195, %195 : vector<16x32xf32>
    %cst_135 = arith.constant dense<0.000000e+00> : vector<16xf32>
    %197 = vector.multi_reduction <add>, %196, %cst_135 [1] : vector<16x32xf32> to vector<16xf32>
    %198 = vector.shape_cast %197 : vector<16xf32> to vector<16x1xf32>
    %cst_136 = arith.constant 3.200000e+01 : f32
    %199 = vector.broadcast %cst_136 : f32 to vector<16x1xf32>
    %200 = arith.divf %198, %199 : vector<16x1xf32>
    %201 = vector.broadcast %193 : vector<16x1xf32> to vector<16x32xf32>
    %202 = arith.subf %187, %201 : vector<16x32xf32>
    %cst_137 = arith.constant 9.99999974E-6 : f32
    %203 = vector.broadcast %cst_137 : f32 to vector<16x1xf32>
    %204 = arith.addf %200, %203 : vector<16x1xf32>
    %205 = math.rsqrt %204 : vector<16x1xf32>
    %206 = vector.broadcast %205 : vector<16x1xf32> to vector<16x32xf32>
    %207 = arith.mulf %202, %206 : vector<16x32xf32>
    %208 = vector.broadcast %188 : vector<1x32xf32> to vector<16x32xf32>
    %209 = arith.mulf %207, %208 : vector<16x32xf32>
    %210 = vector.broadcast %189 : vector<1x32xf32> to vector<16x32xf32>
    %211 = arith.addf %209, %210 : vector<16x32xf32>
    %c0_138 = arith.constant 0 : index
    %c0_139 = arith.constant 0 : index
    %212 = vector.load %arg13[%c0_138, %c0_139] : memref<32x64xf32, #tpu.memory_space<vmem>>, vector<32x64xf32>
    %cst_140 = arith.constant dense<0.000000e+00> : vector<16x64xf32>
    %213 = tpu.matmul %211, %212, %cst_140 {dimension_numbers = #tpu.dot_dimension_numbers<[1], [0], [0], [1], [0, 0, 1, 1], [], []>} : vector<16x32xf32>, vector<32x64xf32>, vector<16x64xf32> -> vector<16x64xf32>
    %c0_141 = arith.constant 0 : index
    %c0_142 = arith.constant 0 : index
    %214 = vector.load %arg14[%c0_141, %c0_142] : memref<1x64xf32, #tpu.memory_space<vmem>>, vector<1x64xf32>
    %215 = vector.broadcast %214 : vector<1x64xf32> to vector<16x64xf32>
    %216 = arith.addf %213, %215 : vector<16x64xf32>
    %cst_143 = arith.constant 0.000000e+00 : f32
    %217 = vector.broadcast %cst_143 : f32 to vector<16x64xf32>
    %218 = arith.maximumf %216, %217 : vector<16x64xf32>
    %c0_144 = arith.constant 0 : index
    %c0_145 = arith.constant 0 : index
    %219 = vector.load %arg15[%c0_144, %c0_145] : memref<64x32xf32, #tpu.memory_space<vmem>>, vector<64x32xf32>
    %cst_146 = arith.constant dense<0.000000e+00> : vector<16x32xf32>
    %220 = tpu.matmul %218, %219, %cst_146 {dimension_numbers = #tpu.dot_dimension_numbers<[1], [0], [0], [1], [0, 0, 1, 1], [], []>} : vector<16x64xf32>, vector<64x32xf32>, vector<16x32xf32> -> vector<16x32xf32>
    %c0_147 = arith.constant 0 : index
    %c0_148 = arith.constant 0 : index
    %221 = vector.load %arg16[%c0_147, %c0_148] : memref<1x32xf32, #tpu.memory_space<vmem>>, vector<1x32xf32>
    %222 = vector.broadcast %221 : vector<1x32xf32> to vector<16x32xf32>
    %223 = arith.addf %220, %222 : vector<16x32xf32>
    %224 = arith.addf %223, %223 : vector<16x32xf32>
    %c0_149 = arith.constant 0 : index
    %c0_150 = arith.constant 0 : index
    %225 = vector.load %arg17[%c0_149, %c0_150] : memref<1x32xf32, #tpu.memory_space<vmem>>, vector<1x32xf32>
    %c0_151 = arith.constant 0 : index
    %c0_152 = arith.constant 0 : index
    %226 = vector.load %arg18[%c0_151, %c0_152] : memref<1x32xf32, #tpu.memory_space<vmem>>, vector<1x32xf32>
    %cst_153 = arith.constant dense<0.000000e+00> : vector<16xf32>
    %227 = vector.multi_reduction <add>, %224, %cst_153 [1] : vector<16x32xf32> to vector<16xf32>
    %228 = vector.shape_cast %227 : vector<16xf32> to vector<16x1xf32>
    %cst_154 = arith.constant 3.200000e+01 : f32
    %229 = vector.broadcast %cst_154 : f32 to vector<16x1xf32>
    %230 = arith.divf %228, %229 : vector<16x1xf32>
    %231 = vector.broadcast %230 : vector<16x1xf32> to vector<16x32xf32>
    %232 = arith.subf %224, %231 : vector<16x32xf32>
    %233 = arith.mulf %232, %232 : vector<16x32xf32>
    %cst_155 = arith.constant dense<0.000000e+00> : vector<16xf32>
    %234 = vector.multi_reduction <add>, %233, %cst_155 [1] : vector<16x32xf32> to vector<16xf32>
    %235 = vector.shape_cast %234 : vector<16xf32> to vector<16x1xf32>
    %cst_156 = arith.constant 3.200000e+01 : f32
    %236 = vector.broadcast %cst_156 : f32 to vector<16x1xf32>
    %237 = arith.divf %235, %236 : vector<16x1xf32>
    %238 = vector.broadcast %230 : vector<16x1xf32> to vector<16x32xf32>
    %239 = arith.subf %224, %238 : vector<16x32xf32>
    %cst_157 = arith.constant 9.99999974E-6 : f32
    %240 = vector.broadcast %cst_157 : f32 to vector<16x1xf32>
    %241 = arith.addf %237, %240 : vector<16x1xf32>
    %242 = math.rsqrt %241 : vector<16x1xf32>
    %243 = vector.broadcast %242 : vector<16x1xf32> to vector<16x32xf32>
    %244 = arith.mulf %239, %243 : vector<16x32xf32>
    %245 = vector.broadcast %225 : vector<1x32xf32> to vector<16x32xf32>
    %246 = arith.mulf %244, %245 : vector<16x32xf32>
    %247 = vector.broadcast %226 : vector<1x32xf32> to vector<16x32xf32>
    %248 = arith.addf %246, %247 : vector<16x32xf32>
    %c0_158 = arith.constant 0 : index
    %c0_159 = arith.constant 0 : index
    %249 = vector.load %arg19[%c0_158, %c0_159] : memref<16x32xf32, #tpu.memory_space<vmem>>, vector<16x32xf32>
    tpu.vector_store %arg19[%c0_158, %c0_159], %248 {strides = array<i32>} : memref<16x32xf32, #tpu.memory_space<vmem>>, vector<16x32xf32>,
    return
  }
}

</mosaic_0001>

<bundles_post_ra>
// kernel: tpu_custom_call.1
= control target key start
LH: loop header
LB: loop body
LE: loop exit
PB: predicated region body
PF: predicated region fallthrough
CT: control target
= control target key end

     0   :  { %s2146_s0 = inlined_call_operand.vmem [shape: f32[16,32], index: 0, kind: input, shape index: {}]   ;;  %s2147_s1 = inlined_call_operand.vmem [shape: f32[16,32], index: 1, kind: input, shape index: {}]   ;;  %s2148_s2 = inlined_call_operand.vmem [shape: f32[16,32], index: 2, kind: input, shape index: {}]   ;;  %s2149_s3 = inlined_call_operand.vmem [shape: f32[4,32,8], index: 3, kind: input, shape index: {}]   ;;  %s2150_s4 = inlined_call_operand.vmem [shape: f32[4,32,8], index: 4, kind: input, shape index: {}]   ;;  %s2151_s5 = inlined_call_operand.vmem [shape: f32[4,32,8], index: 5, kind: input, shape index: {}]   ;;  %s2152_s6 = inlined_call_operand.vmem [shape: f32[4,1,8], index: 6, kind: input, shape index: {}]   ;;  %s2153_s7 = inlined_call_operand.vmem [shape: f32[4,1,8], index: 7, kind: input, shape index: {}]   ;;  %s2154_s8 = inlined_call_operand.vmem [shape: f32[4,1,8], index: 8, kind: input, shape index: {}]   ;;  %s2155_s9 = inlined_call_operand.vmem [shape: f32[4,8,32], index: 9, kind: input, shape index: {}]   ;;  %s2156_s10 = inlined_call_operand.vmem [shape: f32[1,32], index: 10, kind: input, shape index: {}]   ;;  %s2157_s11 = inlined_call_operand.vmem [shape: f32[1,32], index: 11, kind: input, shape index: {}]   ;;  %s2158_s12 = inlined_call_operand.vmem [shape: f32[1,32], index: 12, kind: input, shape index: {}]   ;;  %s2159_s13 = inlined_call_operand.vmem [shape: f32[32,64], index: 13, kind: input, shape index: {}]   ;;  %s2160_s14 = inlined_call_operand.vmem [shape: f32[1,64], index: 14, kind: input, shape index: {}]   ;;  %s2161_s15 = inlined_call_operand.vmem [shape: f32[64,32], index: 15, kind: input, shape index: {}]   ;;  %s2162_s16 = inlined_call_operand.vmem [shape: f32[1,32], index: 16, kind: input, shape index: {}]   ;;  %s2163_s17 = inlined_call_operand.vmem [shape: f32[1,32], index: 17, kind: input, shape index: {}]   ;;  %s2164_s18 = inlined_call_operand.vmem [shape: f32[1,32], index: 18, kind: input, shape index: {}]   ;;  %s2165_s19 = inlined_call_operand.hbm [shape: f32[16,32], index: 19, kind: output, shape index: {0}]   ;;  %s2166_s20 = inlined_call_operand.hbm [shape: f32[2,8,8], index: 20, kind: output, shape index: {1}]  }
   0x1   :  { %2172 = sst [smem:[#allocation8_spill]] %s2146_s0 }
   0x2   :  { %2173 = sst [smem:[#allocation9_spill]] %s2147_s1 }
   0x3   :  { %2174 = sst [smem:[#allocation10_spill]] %s2148_s2 }
   0x4   :  { %2175 = sst [smem:[#allocation11_spill]] %s2149_s3 }
   0x5   :  { %2176 = sst [smem:[#allocation12_spill]] %s2150_s4 }
   0x6   :  { %26 = vsyncpa [#allocation3], 0  ;;  %s2177_s23 = sld [smem:[#allocation12_spill]]  ;;  %vm80_vm0 = vcmask 261120  }
   0x7   :  { %s2178_s25 = sld [smem:[#allocation11_spill]] }
   0x8   :  { %s2179_s26 = sld [smem:[#allocation9_spill]] }
   0x9   :  { %s2180_s4 = sld [smem:[#allocation8_spill]] }
   0xc   :  { %v115_v0 = vld [vmem:[%s2177_s23 + $0x18] sm:$0xff]  ;;  %v114_v2 = vld [vmem:[%s2177_s23 + $0x10] sm:$0xff]  ;;  %v113_v4 = vld [vmem:[%s2177_s23 + $0x8] sm:$0xff] }
   0xd   :  { %v75_v1 = vld [vmem:[%s2178_s25 + $0x18] sm:$0xff]  ;;  %138 = vmatpush.msra.mxu1 %v115_v0  ;;  %v74_v3 = vld [vmem:[%s2178_s25 + $0x10] sm:$0xff]  ;;  %v73_v5 = vld [vmem:[%s2178_s25 + $0x8] sm:$0xff] }
   0xe   :  { %99 = vmatpush.msra.mxu0 %v75_v1  ;;  %v112_v6 = vld [vmem:[%s2177_s23] sm:$0xff] }
   0xf   :  { %139 = vmatpush.msra.mxu1 %v114_v2  ;;  %v72_v7 = vld [vmem:[%s2178_s25] sm:$0xff] }
  0x10   :  { %100 = vmatpush.msra.mxu0 %v74_v3  ;;  %v1720_v8 = vld [vmem:[%s2179_s26] sm:$0xff] }
  0x11   :  { %v1725_v9 = vld [vmem:[%s2180_s4] sm:$0xff]  ;;  %140 = vmatpush.msra.mxu1 %v113_v4 }
  0x12   :  { %101 = vmatpush.msra.mxu0 %v73_v5 }
  0x13   :  { %141 = vmatpush.msra.mxu1 %v112_v6 }
  0x14   :  { %102 = vmatpush.msra.mxu0 %v72_v7  ;;  %1359 = vmatmul.msk.f32.vlgmr.msra.gmra.mxu1 %vm80_vm0, %v1720_v8 }
  0x15   :  { %1357 = vmatmul.msk.f32.vlgmr.msra.gmra.mxu0 %vm80_vm0, %v1725_v9 }
  0x16   :  { %27 = vsyncpa [#allocation5], 0  ;;  %v1734_v10 = vld [vmem:[%s2179_s26 + $0x8] sm:$0xff]  ;;  %v1470_v12 = vld [vmem:[%s2153_s7] ss:$0 sm:$0xff]  ;;  %vm186_vm1 = vcmask 64512  }
  0x17   :  { %v1739_v11 = vld [vmem:[%s2180_s4 + $0x8] sm:$0xff]  ;;  %v1471_v13 = vld [vmem:[%s2152_s6] ss:$0 sm:$0xff]  ;;  %v152_v24 = vld [vmem:[%s2151_s5 + $0x18] sm:$0xff]  ;;  %s2181_s22 = sld [smem:[#allocation10_spill]]  ;;  %vm1231_vm9 = vcmask 523264  }
  0x18   :  { %v151_v25 = vld [vmem:[%s2151_s5 + $0x10] sm:$0xff]  ;;  %175 = vmatpush.msra.mxu2 %v152_v24  ;;  %v150_v26 = vld [vmem:[%s2151_s5 + $0x8] sm:$0xff]  ;;  %v149_v27 = vld [vmem:[%s2151_s5] sm:$0xff]  ;;  %s1340_s21 = sshll.u32 %s2166_s20, 4  ;;  %s1585_s1 = smov 128   ;;  %s1341_s21 = int_to_ptr.hbm [resolvable:$true] %s1340_s21 }
  0x19   :  { %v1379_v34 = vld [vmem:[%s2177_s23 + $0x38] sm:$0xff]  ;;  %v1378_v35 = vld [vmem:[%s2177_s23 + $0x30] sm:$0xff]  ;;  %v1377_v36 = vld [vmem:[%s2177_s23 + $0x28] sm:$0xff] }
  0x1a   :  { %176 = vmatpush.msra.mxu2 %v151_v25  ;;  %v1376_v37 = vld [vmem:[%s2177_s23 + $0x20] sm:$0xff]  ;;  %v1372_v38 = vld [vmem:[%s2178_s25 + $0x38] sm:$0xff]  ;;  %v1371_v39 = vld [vmem:[%s2178_s25 + $0x30] sm:$0xff] }
  0x1b   :  { %332 = vmatpush.msrb.mxu1 %v1372_v38  ;;  %v1370_v40 = vld [vmem:[%s2178_s25 + $0x28] sm:$0xff]  ;;  %v1369_v41 = vld [vmem:[%s2178_s25 + $0x20] sm:$0xff] }
  0x1c   :  { %1360 = vmatmul.msk.f32.gmra.mxu1 %vm80_vm0, %v1734_v10  ;;  %177 = vmatpush.msra.mxu2 %v150_v26  ;;  %v1472_v52 = vld [vmem:[%s2154_s8] ss:$0 sm:$0xff]  ;;  %v1473_v57 = vld [vmem:[%s2153_s7 + $0x1] ss:$0 sm:$0xff] }
  0x1d   :  { %1358 = vmatmul.msk.f32.gmra.mxu0 %vm80_vm0, %v1739_v11  ;;  %v1770_v28 = vld [vmem:[%s2181_s22] sm:$0xff]  ;;  %v1779_v33 = vld [vmem:[%s2181_s22 + $0x8] sm:$0xff]  ;;  %333 = vmatpush.msrb.mxu1 %v1371_v39  ;;  %s1586_s22 = smov 8  }
  0x1e   :  { %178 = vmatpush.msra.mxu2 %v149_v27  ;;  %v1474_v2 = vld [vmem:[%s2152_s6 + $0x1] ss:$0 sm:$0xff] }
  0x1f   :  { %1361 = vmatmul.msk.f32.vlgmr.msra.gmra.mxu2 %vm80_vm0, %v1770_v28  ;;  %334 = vmatpush.msrb.mxu1 %v1370_v40  ;;  %v1383_v25 = vld [vmem:[%s2151_s5 + $0x20] sm:$0xff] }
  0x20   :  { %367 = vmatpush.msrb.mxu2 %v1379_v34  ;;  %v1475_v38 = vld [vmem:[%s2154_s8 + $0x1] ss:$0 sm:$0xff] }
  0x21   :  { %335 = vmatpush.msrb.mxu1 %v1369_v41 }
  0x22   :  { %368 = vmatpush.msrb.mxu2 %v1378_v35 }
  0x24   :  { %369 = vmatpush.msrb.mxu2 %v1377_v36  ;;  %1374 = vmatmul.msk.f32.vlgmr.msrb.gmra.mxu1 %vm80_vm0, %v1725_v9 }
  0x26   :  { %370 = vmatpush.msrb.mxu2 %v1376_v37 }
  0x27   :  { %1362 = vmatmul.msk.f32.gmra.mxu2 %vm80_vm0, %v1779_v33 }
  0x2c   :  { %1375 = vmatmul.msk.f32.gmra.mxu1 %vm80_vm0, %v1739_v11 }
  0x2f   :  { %1381 = vmatmul.msk.f32.vlgmr.msrb.gmra.mxu2 %vm80_vm0, %v1720_v8 }
  0x37   :  { %1382 = vmatmul.msk.f32.gmra.mxu2 %vm80_vm0, %v1734_v10 }
  0x91   :  { %v143_v14 = vpop.f32.mrf.mxu1 }
  0x92   :  { %v104_v15 = vpop.f32.mrf.mxu0  ;;  %v144_v16 = vadd.f32 %v1470_v12, %v143_v14 }
  0x93   :  { %v105_v17 = vadd.f32 %v1471_v13, %v104_v15  ;;  %v309_v15 = vld [vmem:[%s2155_s9] sm:$0xff] }
  0x94   :  { %1363 = vmatpush.xpose.msk.msra.mxu3 %vm186_vm1, %v144_v16  ;;  %v1386_v16 = vld [vmem:[%s2151_s5 + $0x38] sm:$0xff] }
  0x95   :  { %v110_v18 = vmul.f32 0.35355338, %v105_v17  ;;  %v1385_v17 = vld [vmem:[%s2151_s5 + $0x30] sm:$0xff] }
  0x97   :  { %1364 = vmatmul.msk.f32.vlgmr.msra.gmra.mxu3 %vm186_vm1, %v110_v18  ;;  %v1384_v18 = vld [vmem:[%s2151_s5 + $0x28] sm:$0xff] }
  0x99   :  { %v146_v19 = vpop.f32.mrf.mxu1 }
  0x9a   :  { %v107_v20 = vpop.f32.mrf.mxu0  ;;  %v147_v21 = vadd.f32 %v1470_v12, %v146_v19 }
  0x9b   :  { %v108_v22 = vadd.f32 %v1471_v13, %v107_v20 }
  0x9c   :  { %1365 = vmatpush.xpose.msk.msrb.mxu3 %vm186_vm1, %v147_v21 }
  0x9d   :  { %v111_v23 = vmul.f32 0.35355338, %v108_v22 }
  0x9f   :  { %1366 = vmatmul.msk.f32.vlgmr.msrb.gmra.mxu3 %vm186_vm1, %v111_v23 }
  0xa1   :  { %v337_v1 = vpop.f32.mrf.mxu1 }
  0xa2   :  { %v180_v53 = vpop.f32.mrf.mxu2  ;;  %v338_v6 = vadd.f32 %v1474_v2, %v337_v1 }
  0xa3   :  { %v181_v54 = vadd.f32 %v1472_v52, %v180_v53 }
  0xa4   :  { %v343_v7 = vmul.f32 0.35355338, %v338_v6 }
  0xa5   :  { %281 = vmatpush.msra.mxu3 %v181_v54 }
  0xa7   :  { %400 = vmatpush.msrb.mxu3 %v1386_v16  ;;  %v1416_v16 = vld [vmem:[%s2151_s5 + $0x48] sm:$0xff] }
  0xa9   :  { %v340_v12 = vpop.f32.mrf.mxu1  ;;  %401 = vmatpush.msrb.mxu3 %v1385_v17 }
  0xaa   :  { %v183_v55 = vpop.f32.mrf.mxu2  ;;  %v341_v13 = vadd.f32 %v1474_v2, %v340_v12 }
  0xab   :  { %v184_v56 = vadd.f32 %v1472_v52, %v183_v55  ;;  %402 = vmatpush.msrb.mxu3 %v1384_v18  ;;  %v1415_v18 = vld [vmem:[%s2151_s5 + $0x40] sm:$0xff] }
  0xac   :  { %v344_v14 = vmul.f32 0.35355338, %v341_v13 }
  0xad   :  { %304 = vmatpush.msrb.mxu0 %v184_v56  ;;  %403 = vmatpush.msrb.mxu3 %v1383_v25 }
  0xb2   :  { %v372_v58 = vpop.f32.mrf.mxu2 }
  0xb3   :  { %v373_v59 = vadd.f32 %v1473_v57, %v372_v58 }
  0xb5   :  { %1390 = vmatpush.xpose.msk.msra.mxu0 %vm186_vm1, %v373_v59 }
  0xba   :  { %v375_v0 = vpop.f32.mrf.mxu2 }
  0xbb   :  { %v376_v4 = vadd.f32 %v1473_v57, %v375_v0  ;;  %v1396_v57 = vld [vmem:[%s2155_s9 + $0x8] sm:$0xff] }
 0x11a   :  { %v210_v29 = vpop.f32.mrf.mxu3 }
 0x11b   :  { %v239_v30 = vsel %vm186_vm1, %v210_v29, -inf }
 0x11c   :  { %240 = vmax.xlane.f32.xlu1 %v239_v30 }
 0x122   :  { %v236_v31 = vpop.f32.mrf.mxu3 }
 0x123   :  { %v242_v32 = vsel %vm186_vm1, %v236_v31, -inf }
 0x124   :  { %243 = vmax.xlane.f32.xlu0 %v242_v32 }
 0x18f   :  { %v241_v42 = vpop.xlane.xlu1 %240 }
 0x190   :  { %v245_v43 = vsub.f32 %v210_v29, %v241_v42 }
 0x192   :  { %v247_v44 = vmul.f32 1.442695, %v245_v43  ;;  %v1411_v43 = vld [vmem:[%s2177_s23 + $0x58] sm:$0xff] }
 0x194   :  { %1489 = vpow2.f32 %v247_v44  ;;  %v1410_v44 = vld [vmem:[%s2177_s23 + $0x50] sm:$0xff] }
 0x197   :  { %v244_v45 = vpop.xlane.xlu0 %243 }
 0x198   :  { %v246_v46 = vsub.f32 %v236_v31, %v244_v45  ;;  %v1409_v45 = vld [vmem:[%s2177_s23 + $0x48] sm:$0xff] }
 0x19a   :  { %v1490_v47 = vpop.eup %1489  ;;  %v249_v48 = vmul.f32 1.442695, %v246_v46  ;;  %v1408_v46 = vld [vmem:[%s2177_s23 + $0x40] sm:$0xff] }
 0x19b   :  { %v251_v49 = vsel %vm186_vm1, %v1490_v47, 0.0 }
 0x19c   :  { %1491 = vpow2.f32 %v249_v48  ;;  %252 = vadd.xlane.f32.xlu1 %v251_v49  ;;  %v1403_v48 = vld [vmem:[%s2178_s25 + $0x50] sm:$0xff]  ;;  %v1402_v49 = vld [vmem:[%s2178_s25 + $0x48] sm:$0xff] }
 0x1a2   :  { %v1492_v50 = vpop.eup %1491 }
 0x1a3   :  { %v254_v51 = vsel %vm186_vm1, %v1492_v50, 0.0 }
 0x1a4   :  { %255 = vadd.xlane.f32.xlu0 %v254_v51 }
 0x20f   :  { %v253_v60 = vpop.xlane.xlu1 %252 }
 0x210   :  { %1493 = vrcp.f32 %v253_v60  ;;  %v1476_v60 = vld [vmem:[%s2153_s7 + $0x2] ss:$0 sm:$0xff] }
 0x216   :  { %v1494_v61 = vpop.eup %1493 }
 0x217   :  { %v1824_v62 = vmul.f32 %v1494_v61, %v1490_v47  ;;  %v256_v63 = vpop.xlane.xlu0 %255  ;;  %v1404_v47 = vld [vmem:[%s2178_s25 + $0x58] sm:$0xff]  ;;  %v1477_v61 = vld [vmem:[%s2152_s6 + $0x2] ss:$0 sm:$0xff] }
 0x218   :  { %1495 = vrcp.f32 %v256_v63 }
 0x219   :  { %1367 = vmatmul.msk.f32.vlgmr.msra.gmra.mxu3 %vm186_vm1, %v1824_v62 }
 0x21a   :  { %556 = vmatpush.msra.mxu3 %v1396_v57 }
 0x21e   :  { %v1496_v3 = vpop.eup %1495 }
 0x21f   :  { %v1831_v5 = vmul.f32 %v1496_v3, %v1492_v50  ;;  %v1401_v50 = vld [vmem:[%s2178_s25 + $0x40] sm:$0xff] }
 0x221   :  { %1368 = vmatmul.msk.f32.vlgmr.msrb.gmra.mxu0 %vm186_vm1, %v1831_v5  ;;  %1388 = vmatmul.msk.f32.vlgmr.msrb.gmra.mxu3 %vm80_vm0, %v1770_v28 }
 0x222   :  { %1392 = vmatpush.xpose.msk.msrb.mxu0 %vm186_vm1, %v376_v4 }
 0x229   :  { %1391 = vmatmul.msk.f32.vlgmr.msra.gmra.mxu0 %vm186_vm1, %v343_v7  ;;  %1389 = vmatmul.msk.f32.gmra.mxu3 %vm80_vm0, %v1779_v33 }
 0x22a   :  { %585 = vmatpush.msra.mxu0 %v309_v15  ;;  %v1417_v15 = vld [vmem:[%s2151_s5 + $0x50] sm:$0xff] }
 0x231   :  { %1393 = vmatmul.msk.f32.vlgmr.msrb.gmra.mxu0 %vm186_vm1, %v344_v14  ;;  %v1418_v14 = vld [vmem:[%s2151_s5 + $0x58] sm:$0xff] }
 0x232   :  { %683 = vmatpush.msrb.mxu3 %v1418_v14 }
 0x234   :  { %684 = vmatpush.msrb.mxu3 %v1417_v15 }
 0x236   :  { %685 = vmatpush.msrb.mxu3 %v1416_v16 }
 0x238   :  { %686 = vmatpush.msrb.mxu3 %v1415_v18 }
 0x29c   :  { %v283_v19 = vpop.f32.mrf.mxu3 }
 0x29d   :  { %1399 = vmatmul.msk.f32.vlgmr.msra.gmra.mxu0 %vm186_vm1, %v283_v19 }
 0x29e   :  { %v306_v20 = vpop.f32.mrf.mxu0 }
 0x2a4   :  { %v405_v39 = vpop.f32.mrf.mxu3 }
 0x2a5   :  { %1400 = vmatmul.msk.f32.gmra.mxu0 %vm186_vm1, %v306_v20  ;;  %v406_v40 = vadd.f32 %v1475_v38, %v405_v39 }
 0x2a6   :  { %v434_v21 = vpop.f32.mrf.mxu0 }
 0x2a7   :  { %v463_v24 = vsel %vm186_vm1, %v434_v21, -inf  ;;  %505 = vmatpush.msra.mxu1 %v406_v40 }
 0x2a9   :  { %615 = vmatpush.msrb.mxu1 %v1404_v47  ;;  %v1432_v47 = vld [vmem:[%s2178_s25 + $0x68] sm:$0xff] }
 0x2ab   :  { %616 = vmatpush.msrb.mxu1 %v1403_v48 }
 0x2ac   :  { %v408_v41 = vpop.f32.mrf.mxu3 }
 0x2ad   :  { %v409_v42 = vadd.f32 %v1475_v38, %v408_v41  ;;  %617 = vmatpush.msrb.mxu1 %v1402_v49  ;;  %v1478_v38 = vld [vmem:[%s2154_s8 + $0x2] ss:$0 sm:$0xff]  ;;  %v1441_v41 = vld [vmem:[%s2177_s23 + $0x78] sm:$0xff] }
 0x2ae   :  { %v460_v22 = vpop.f32.mrf.mxu0  ;;  %v1438_v49 = vld [vmem:[%s2177_s23 + $0x60] sm:$0xff] }
 0x2af   :  { %v466_v23 = vsel %vm186_vm1, %v460_v22, -inf  ;;  %528 = vmatpush.msra.mxu2 %v409_v42  ;;  %618 = vmatpush.msrb.mxu1 %v1401_v50  ;;  %v1434_v42 = vld [vmem:[%s2178_s25 + $0x78] sm:$0xff]  ;;  %v1431_v50 = vld [vmem:[%s2178_s25 + $0x60] sm:$0xff] }
 0x2b0   :  { %467 = vmax.xlane.f32.xlu2 %v466_v23 }
 0x2b1   :  { %650 = vmatpush.msrb.mxu2 %v1411_v43  ;;  %v1440_v43 = vld [vmem:[%s2177_s23 + $0x70] sm:$0xff] }
 0x2b3   :  { %651 = vmatpush.msrb.mxu2 %v1410_v44  ;;  %v1433_v44 = vld [vmem:[%s2178_s25 + $0x70] sm:$0xff] }
 0x2b5   :  { %652 = vmatpush.msrb.mxu2 %v1409_v45  ;;  %v1439_v45 = vld [vmem:[%s2177_s23 + $0x68] sm:$0xff] }
 0x2b7   :  { %653 = vmatpush.msrb.mxu2 %v1408_v46 }
 0x2b8   :  { %464 = vmax.xlane.f32.xlu2 %v463_v24 }
 0x31a   :  { %v1930_v17 = vpop.f32.mrf.mxu0 }
 0x322   :  { %v1937_v19 = vpop.f32.mrf.mxu0 }
 0x323   :  { %v468_v26 = vpop.xlane.xlu2 %467 }
 0x324   :  { %v470_v27 = vsub.f32 %v460_v22, %v468_v26 }
 0x326   :  { %v473_v29 = vmul.f32 1.442695, %v470_v27 }
 0x328   :  { %1497 = vpow2.f32 %v473_v29 }
 0x32b   :  { %v465_v30 = vpop.xlane.xlu2 %464 }
 0x32c   :  { %v469_v31 = vsub.f32 %v434_v21, %v465_v30 }
 0x32e   :  { %v1498_v32 = vpop.eup %1497  ;;  %v471_v34 = vmul.f32 1.442695, %v469_v31 }
 0x32f   :  { %v478_v35 = vsel %vm186_vm1, %v1498_v32, 0.0 }
 0x330   :  { %1499 = vpow2.f32 %v471_v34  ;;  %479 = vadd.xlane.f32.xlu0 %v478_v35 }
 0x336   :  { %v1500_v36 = vpop.eup %1499 }
 0x337   :  { %v475_v37 = vsel %vm186_vm1, %v1500_v36, 0.0 }
 0x338   :  { %476 = vadd.xlane.f32.xlu1 %v475_v37 }
 0x3a3   :  { %v480_v51 = vpop.xlane.xlu0 %479 }
 0x3a4   :  { %1501 = vrcp.f32 %v480_v51 }
 0x3aa   :  { %v1502_v52 = vpop.eup %1501 }
 0x3ab   :  { %v1890_v53 = vmul.f32 %v1502_v52, %v1498_v32  ;;  %v477_v54 = vpop.xlane.xlu1 %476 }
 0x3ac   :  { %1503 = vrcp.f32 %v477_v54 }
 0x3ad   :  { %1395 = vmatmul.msk.f32.vlgmr.msra.gmra.mxu2 %vm186_vm1, %v1890_v53 }
 0x3b2   :  { %v1504_v55 = vpop.eup %1503 }
 0x3b3   :  { %v1894_v56 = vmul.f32 %v1504_v55, %v1500_v36 }
 0x3b5   :  { %1394 = vmatmul.msk.f32.vlgmr.msra.gmra.mxu1 %vm186_vm1, %v1894_v56  ;;  %1413 = vmatmul.msk.f32.vlgmr.msrb.gmra.mxu2 %vm80_vm0, %v1720_v8  ;;  %v485_v54 = vadd.f32 %v1894_v56, %v1824_v62  ;;  %v1428_v62 = vld [vmem:[%s2155_s9 + $0x10] sm:$0xff] }
 0x3bd   :  { %1406 = vmatmul.msk.f32.vlgmr.msrb.gmra.mxu1 %vm80_vm0, %v1725_v9  ;;  %1414 = vmatmul.msk.f32.gmra.mxu2 %vm80_vm0, %v1734_v10 }
 0x3c5   :  { %1407 = vmatmul.msk.f32.gmra.mxu1 %vm80_vm0, %v1739_v11 }
 0x430   :  { %v530_v58 = vpop.f32.mrf.mxu2 }
 0x432   :  { %v507_v59 = vpop.f32.mrf.mxu1 }
 0x433   :  { %1397 = vmatmul.msk.f32.vlgmr.msra.gmra.mxu3 %vm186_vm1, %v507_v59 }
 0x434   :  { %906 = vmatpush.msra.mxu3 %v1441_v41 }
 0x436   :  { %907 = vmatpush.msra.mxu3 %v1440_v43 }
 0x438   :  { %v655_v63 = vpop.f32.mrf.mxu2  ;;  %908 = vmatpush.msra.mxu3 %v1439_v45 }
 0x439   :  { %v656_v0 = vadd.f32 %v1476_v60, %v655_v63 }
 0x43a   :  { %v620_v1 = vpop.f32.mrf.mxu1  ;;  %909 = vmatpush.msra.mxu3 %v1438_v49 }
 0x43b   :  { %v621_v2 = vadd.f32 %v1477_v61, %v620_v1  ;;  %1398 = vmatmul.msk.f32.gmra.mxu3 %vm186_vm1, %v530_v58  ;;  %1422 = vmatpush.xpose.msk.msrb.mxu0 %vm186_vm1, %v656_v0 }
 0x43d   :  { %v626_v3 = vmul.f32 0.35355338, %v621_v2 }
 0x43f   :  { %1423 = vmatmul.msk.f32.vlgmr.msrb.gmra.mxu0 %vm186_vm1, %v626_v3 }
 0x440   :  { %v658_v4 = vpop.f32.mrf.mxu2 }
 0x441   :  { %v659_v6 = vadd.f32 %v1476_v60, %v658_v4  ;;  %v486_v60 = vadd.f32 %v1890_v53, %v1831_v5  ;;  %v1479_v5 = vld [vmem:[%s2153_s7 + $0x3] ss:$0 sm:$0xff] }
 0x442   :  { %v623_v7 = vpop.f32.mrf.mxu1 }
 0x443   :  { %v624_v12 = vadd.f32 %v1477_v61, %v623_v7  ;;  %1424 = vmatpush.xpose.msk.msra.mxu1 %vm186_vm1, %v659_v6  ;;  %1420 = vmatmul.msk.f32.vlgmr.msrb.gmra.mxu3 %vm80_vm0, %v1770_v28 }
 0x445   :  { %v627_v13 = vmul.f32 0.35355338, %v624_v12 }
 0x447   :  { %1425 = vmatmul.msk.f32.vlgmr.msra.gmra.mxu1 %vm186_vm1, %v627_v13 }
 0x448   :  { %839 = vmatpush.msrb.mxu1 %v1428_v62 }
 0x44b   :  { %1421 = vmatmul.msk.f32.gmra.mxu3 %vm80_vm0, %v1779_v33 }
 0x453   :  { %1443 = vmatmul.msk.f32.vlgmr.msra.gmra.mxu3 %vm80_vm0, %v1720_v8 }
 0x45b   :  { %1444 = vmatmul.msk.f32.gmra.mxu3 %vm80_vm0, %v1734_v10 }
 0x4b6   :  { %v1945_v36 = vpop.f32.mrf.mxu3 }
 0x4b7   :  { %v588_v14 = vadd.f32 %v1930_v17, %v1945_v36  ;;  %v1448_v17 = vld [vmem:[%s2151_s5 + $0x78] sm:$0xff] }
 0x4bc   :  { %v717_v20 = vpop.f32.mrf.mxu0 }
 0x4bd   :  { %v746_v21 = vsel %vm186_vm1, %v717_v20, -inf }
 0x4be   :  { %747 = vmax.xlane.f32.xlu2 %v746_v21  ;;  %v1947_v37 = vpop.f32.mrf.mxu3 }
 0x4bf   :  { %v591_v18 = vadd.f32 %v1937_v19, %v1947_v37  ;;  %v1447_v19 = vld [vmem:[%s2151_s5 + $0x70] sm:$0xff] }
 0x4c4   :  { %v743_v22 = vpop.f32.mrf.mxu1 }
 0x4c5   :  { %v749_v23 = vsel %vm186_vm1, %v743_v22, -inf }
 0x4c6   :  { %750 = vmax.xlane.f32.xlu0 %v749_v23  ;;  %v688_v39 = vpop.f32.mrf.mxu3 }
 0x4c7   :  { %v689_v40 = vadd.f32 %v1478_v38, %v688_v39 }
 0x4c9   :  { %788 = vmatpush.msra.mxu2 %v689_v40 }
 0x4cb   :  { %871 = vmatpush.msrb.mxu2 %v1434_v42 }
 0x4cd   :  { %872 = vmatpush.msrb.mxu2 %v1433_v44 }
 0x4ce   :  { %v691_v46 = vpop.f32.mrf.mxu3 }
 0x4cf   :  { %v692_v48 = vadd.f32 %v1478_v38, %v691_v46  ;;  %873 = vmatpush.msrb.mxu2 %v1432_v47 }
 0x4d1   :  { %811 = vmatpush.msra.mxu0 %v692_v48  ;;  %874 = vmatpush.msrb.mxu2 %v1431_v50 }
 0x4d3   :  { %939 = vmatpush.msrb.mxu0 %v1448_v17 }
 0x4d5   :  { %940 = vmatpush.msrb.mxu0 %v1447_v19 }
 0x4d6   :  { %v911_v53 = vpop.f32.mrf.mxu3 }
 0x4d7   :  { %v912_v56 = vadd.f32 %v1479_v5, %v911_v53 }
 0x4d9   :  { %1452 = vmatpush.xpose.msk.msra.mxu1 %vm186_vm1, %v912_v56 }
 0x4de   :  { %v914_v0 = vpop.f32.mrf.mxu3 }
 0x4df   :  { %v915_v1 = vadd.f32 %v1479_v5, %v914_v0 }
 0x531   :  { %v748_v24 = vpop.xlane.xlu2 %747 }
 0x532   :  { %v752_v25 = vsub.f32 %v717_v20, %v748_v24 }
 0x534   :  { %v754_v26 = vmul.f32 1.442695, %v752_v25 }
 0x536   :  { %1505 = vpow2.f32 %v754_v26  ;;  %v1446_v26 = vld [vmem:[%s2151_s5 + $0x68] sm:$0xff] }
 0x537   :  { %941 = vmatpush.msrb.mxu0 %v1446_v26 }
 0x539   :  { %v751_v27 = vpop.xlane.xlu0 %750 }
 0x53a   :  { %v753_v29 = vsub.f32 %v743_v22, %v751_v27  ;;  %v1445_v27 = vld [vmem:[%s2151_s5 + $0x60] sm:$0xff] }
 0x53b   :  { %942 = vmatpush.msrb.mxu0 %v1445_v27  ;;  %v1226_v27 = vld [vmem:[%s2161_s15 + $0x38] sm:$0xff] }
 0x53c   :  { %v1506_v30 = vpop.eup %1505  ;;  %v756_v31 = vmul.f32 1.442695, %v753_v29  ;;  %1246 = vmatpush.msrb.mxu3 %v1226_v27 }
 0x53d   :  { %v758_v32 = vsel %vm186_vm1, %v1506_v30, 0.0 }
 0x53e   :  { %1507 = vpow2.f32 %v756_v31  ;;  %759 = vadd.xlane.f32.xlu1 %v758_v32 }
 0x544   :  { %v1508_v34 = vpop.eup %1507 }
 0x545   :  { %v761_v35 = vsel %vm186_vm1, %v1508_v34, 0.0 }
 0x546   :  { %762 = vadd.xlane.f32.xlu2 %v761_v35 }
 0x5b1   :  { %v760_v51 = vpop.xlane.xlu1 %759 }
 0x5b2   :  { %1509 = vrcp.f32 %v760_v51 }
 0x5b8   :  { %v1510_v52 = vpop.eup %1509 }
 0x5b9   :  { %v766_v55 = vmul.f32 %v1510_v52, %v1506_v30  ;;  %v763_v57 = vpop.xlane.xlu2 %762 }
 0x5ba   :  { %1511 = vrcp.f32 %v763_v57 }
 0x5bb   :  { %v1982_v58 = vadd.f32 %v766_v55, %v485_v54  ;;  %1426 = vmatmul.msk.f32.vlgmr.msra.gmra.mxu2 %vm186_vm1, %v766_v55  ;;  %v1458_v54 = vld [vmem:[%s2155_s9 + $0x18] sm:$0xff] }
 0x5bc   :  { %1454 = vmatpush.xpose.msk.msra.mxu2 %vm186_vm1, %v915_v1 }
 0x5c0   :  { %v1512_v59 = vpop.eup %1511 }
 0x5c1   :  { %v767_v61 = vmul.f32 %v1512_v59, %v1508_v34 }
 0x5c3   :  { %v1987_v63 = vadd.f32 %v767_v61, %v486_v60  ;;  %1427 = vmatmul.msk.f32.vlgmr.msra.gmra.mxu0 %vm186_vm1, %v767_v61  ;;  %1436 = vmatmul.msk.f32.vlgmr.msrb.gmra.mxu2 %vm80_vm0, %v1725_v9 }
 0x5cb   :  { %1437 = vmatmul.msk.f32.gmra.mxu2 %vm80_vm0, %v1739_v11  ;;  %v1480_v11 = vld [vmem:[%s2152_s6 + $0x3] ss:$0 sm:$0xff]  ;;  %1450 = vmatmul.msk.f32.vlgmr.msrb.gmra.mxu0 %vm80_vm0, %v1770_v28 }
 0x5cc   :  { %v1481_v28 = vld [vmem:[%s2154_s8 + $0x3] ss:$0 sm:$0xff]  ;;  %s1327_s8 = sshll.u32 %s2165_s19, 4  ;;  %s1328_s8 = int_to_ptr.hbm [resolvable:$true] %s1327_s8 }
 0x5d3   :  { %1451 = vmatmul.msk.f32.gmra.mxu0 %vm80_vm0, %v1779_v33 }
 0x63e   :  { %v790_v9 = vpop.f32.mrf.mxu2 }
 0x63f   :  { %1429 = vmatmul.msk.f32.vlgmr.msrb.gmra.mxu1 %vm186_vm1, %v790_v9  ;;  %v1583_v9 = vmov 32.0  }
 0x640   :  { %v813_v2 = vpop.f32.mrf.mxu0  ;;  %1095 = vmatpush.msrb.mxu1 %v1458_v54 }
 0x646   :  { %v876_v3 = vpop.f32.mrf.mxu2 }
 0x647   :  { %1430 = vmatmul.msk.f32.gmra.mxu1 %vm186_vm1, %v813_v2  ;;  %v877_v4 = vadd.f32 %v1480_v11, %v876_v3 }
 0x648   :  { %v944_v33 = vpop.f32.mrf.mxu0 }
 0x649   :  { %v882_v6 = vmul.f32 0.35355338, %v877_v4  ;;  %v945_v40 = vadd.f32 %v1481_v28, %v944_v33 }
 0x64b   :  { %1044 = vmatpush.msra.mxu0 %v945_v40 }
 0x64e   :  { %v879_v7 = vpop.f32.mrf.mxu2 }
 0x64f   :  { %v880_v12 = vadd.f32 %v1480_v11, %v879_v7  ;;  %1453 = vmatmul.msk.f32.vlgmr.msra.gmra.mxu1 %vm186_vm1, %v882_v6 }
 0x650   :  { %v947_v41 = vpop.f32.mrf.mxu0 }
 0x651   :  { %v883_v13 = vmul.f32 0.35355338, %v880_v12  ;;  %v948_v42 = vadd.f32 %v1481_v28, %v947_v41 }
 0x653   :  { %1455 = vmatmul.msk.f32.vlgmr.msra.gmra.mxu2 %vm186_vm1, %v883_v13  ;;  %1067 = vmatpush.msrb.mxu0 %v948_v42  ;;  %v1483_v42 = vld [vmem:[%s2157_s11] ss:$0 sm:$0xff] }
 0x6bc   :  { %v841_v15 = vpop.f32.mrf.mxu1 }
 0x6bd   :  { %v2011_v16 = vadd.f32 %v841_v15, %v588_v14 }
 0x6c4   :  { %v844_v20 = vpop.f32.mrf.mxu1 }
 0x6c5   :  { %v2015_v21 = vadd.f32 %v844_v20, %v591_v18 }
 0x6cc   :  { %v973_v22 = vpop.f32.mrf.mxu1 }
 0x6cd   :  { %v1002_v23 = vsel %vm186_vm1, %v973_v22, -inf }
 0x6ce   :  { %1003 = vmax.xlane.f32.xlu0 %v1002_v23  ;;  %v1182_v23 = vld [vmem:[%s2159_s13 + $0x10] sm:$0xff] }
 0x6d6   :  { %v999_v24 = vpop.f32.mrf.mxu2 }
 0x6d7   :  { %v1005_v25 = vsel %vm186_vm1, %v999_v24, -inf }
 0x6d8   :  { %1006 = vmax.xlane.f32.xlu1 %v1005_v25  ;;  %v1180_v25 = vld [vmem:[%s2159_s13] sm:$0xff] }
 0x741   :  { %v1004_v29 = vpop.xlane.xlu0 %1003 }
 0x742   :  { %v1008_v30 = vsub.f32 %v973_v22, %v1004_v29  ;;  %v1183_v22 = vld [vmem:[%s2159_s13 + $0x18] sm:$0xff]  ;;  %v1225_v29 = vld [vmem:[%s2161_s15 + $0x30] sm:$0xff] }
 0x743   :  { %1206 = vmatpush.msrb.mxu2 %v1183_v22  ;;  %1247 = vmatpush.msrb.mxu3 %v1225_v29 }
 0x744   :  { %v1010_v31 = vmul.f32 1.442695, %v1008_v30  ;;  %v1224_v30 = vld [vmem:[%s2161_s15 + $0x28] sm:$0xff] }
 0x745   :  { %1207 = vmatpush.msrb.mxu2 %v1182_v23  ;;  %1248 = vmatpush.msrb.mxu3 %v1224_v30 }
 0x746   :  { %1513 = vpow2.f32 %v1010_v31 }
 0x74b   :  { %v1007_v32 = vpop.xlane.xlu1 %1006 }
 0x74c   :  { %v1514_v34 = vpop.eup %1513  ;;  %v1009_v35 = vsub.f32 %v999_v24, %v1007_v32  ;;  %v1181_v24 = vld [vmem:[%s2159_s13 + $0x8] sm:$0xff] }
 0x74d   :  { %v1014_v36 = vsel %vm186_vm1, %v1514_v34, 0.0  ;;  %1208 = vmatpush.msrb.mxu2 %v1181_v24 }
 0x74e   :  { %v1012_v37 = vmul.f32 1.442695, %v1009_v35  ;;  %1015 = vadd.xlane.f32.xlu2 %v1014_v36  ;;  %v1223_v35 = vld [vmem:[%s2161_s15 + $0x20] sm:$0xff] }
 0x74f   :  { %1209 = vmatpush.msrb.mxu2 %v1180_v25  ;;  %1249 = vmatpush.msrb.mxu3 %v1223_v35 }
 0x750   :  { %1515 = vpow2.f32 %v1012_v37 }
 0x756   :  { %v1516_v38 = vpop.eup %1515 }
 0x757   :  { %v1017_v39 = vsel %vm186_vm1, %v1516_v38, 0.0 }
 0x758   :  { %1018 = vadd.xlane.f32.xlu0 %v1017_v39 }
 0x7c1   :  { %v1016_v43 = vpop.xlane.xlu2 %1015 }
 0x7c2   :  { %1517 = vrcp.f32 %v1016_v43 }
 0x7c8   :  { %v1518_v44 = vpop.eup %1517 }
 0x7c9   :  { %v1022_v45 = vmul.f32 %v1518_v44, %v1514_v34 }
 0x7cb   :  { %v1024_v46 = vadd.f32 %v1022_v45, %v1982_v58  ;;  %1456 = vmatmul.msk.f32.vlgmr.msra.gmra.mxu0 %vm186_vm1, %v1022_v45  ;;  %v1019_v47 = vpop.xlane.xlu0 %1018  ;;  %v1482_v58 = vld [vmem:[%s2156_s10] ss:$0 sm:$0xff] }
 0x7cc   :  { %1519 = vrcp.f32 %v1019_v47 }
 0x7cd   :  { %v1105_v48 = vmul.f32 0.25, %v1024_v46  ;;  %1521 = vrcp.f32 %v1583_v9  ;;  %v1484_v46 = vld [vmem:[%s2158_s12] ss:$0 sm:$0xff] }
 0x7ce   :  { %v1486_v9 = vld [vmem:[%s2162_s16] ss:$0 sm:$0xff] }
 0x7cf   :  { %1107 = vst.msk [vmem:[#allocation4] sm:$0xff] %vm186_vm1, %v1105_v48 }
 0x7d2   :  { %v1520_v49 = vpop.eup %1519 }
 0x7d3   :  { %v1023_v50 = vmul.f32 %v1520_v49, %v1516_v38  ;;  %v1522_v11 = vpop.eup %1521  ;;  %v1222_v38 = vld [vmem:[%s2161_s15 + $0x18] sm:$0xff] }
 0x7d4   :  { %v1126_v2 = vmul.f32 32.0, %v1522_v11  ;;  %vm1130_vm2 = vweird.f32 %v1522_v11  ;;  %1250 = vmatpush.msrb.mxu3 %v1222_v38  ;;  %v1487_v38 = vld [vmem:[%s2163_s17] ss:$0 sm:$0xff]  ;;  %s1587_s17 = smov [#allocation2]  }
 0x7d5   :  { %v1025_v51 = vadd.f32 %v1023_v50, %v1987_v63  ;;  %1457 = vmatmul.msk.f32.vlgmr.msrb.gmra.mxu0 %vm186_vm1, %v1023_v50  ;;  %s1325_s3 = sshll.u32 %s1587_s17, 4  ;;  %s1326_s3 = int_to_ptr.vmem [resolvable:$true] %s1325_s3 }
 0x7d6   :  { %v1127_v3 = vsub.f32 1.0, %v1126_v2 }
 0x7d7   :  { %v1106_v52 = vmul.f32 0.25, %v1025_v51 }
 0x7d8   :  { %v1128_v4 = vmul.f32 %v1522_v11, %v1127_v3 }
 0x7d9   :  { %1108 = vst.msk [vmem:[#allocation4 + $0x8] sm:$0xff] %vm186_vm1, %v1106_v52 }
 0x7da   :  { %v1129_v6 = vadd.f32 %v1522_v11, %v1128_v4 }
 0x848   :  { %v1046_v55 = vpop.f32.mrf.mxu0 }
 0x849   :  { %1459 = vmatmul.msk.f32.vlgmr.msrb.gmra.mxu1 %vm186_vm1, %v1046_v55 }
 0x852   :  { %v1069_v57 = vpop.f32.mrf.mxu0 }
 0x853   :  { %1460 = vmatmul.msk.f32.gmra.mxu1 %vm186_vm1, %v1069_v57 }
 0x8c6   :  { %v1097_v59 = vpop.f32.mrf.mxu1 }
 0x8c7   :  { %v1103_v60 = vadd.f32 %v1097_v59, %v2011_v16  ;;  %v1221_v59 = vld [vmem:[%s2161_s15 + $0x10] sm:$0xff] }
 0x8c8   :  { %1251 = vmatpush.msrb.mxu3 %v1221_v59 }
 0x8c9   :  { %v1113_v61 = vadd.f32 %v1482_v58, %v1103_v60  ;;  %v1220_v60 = vld [vmem:[%s2161_s15 + $0x8] sm:$0xff] }
 0x8ca   :  { %1252 = vmatpush.msrb.mxu3 %v1220_v60 }
 0x8cb   :  { %v1115_v63 = vadd.f32 %v1113_v61, %v1720_v8  ;;  %v2060_v8 = vsel %vm1130_vm2, %v1522_v11, %v1129_v6  ;;  %v1219_v61 = vld [vmem:[%s2161_s15] sm:$0xff] }
 0x8cc   :  { %1253 = vmatpush.msrb.mxu3 %v1219_v61 }
 0x8cd   :  { %v1119_v62 = vsel %vm80_vm0, %v1115_v63, 0.0 }
 0x8ce   :  { %1120 = vadd.xlane.f32.xlu1 %v1119_v62 }
 0x8d0   :  { %v1100_v5 = vpop.f32.mrf.mxu1 }
 0x8d1   :  { %v1104_v53 = vadd.f32 %v1100_v5, %v2015_v21 }
 0x8d3   :  { %v1114_v56 = vadd.f32 %v1482_v58, %v1104_v53 }
 0x8d5   :  { %v1116_v0 = vadd.f32 %v1114_v56, %v1734_v10 }
 0x8d7   :  { %v1122_v1 = vsel %vm80_vm0, %v1116_v0, 0.0 }
 0x8d8   :  { %1123 = vadd.xlane.f32.xlu2 %v1122_v1 }
 0x941   :  { %v1121_v7 = vpop.xlane.xlu1 %1120 }
 0x942   :  { %v1132_v12 = vmul.f32 %v2060_v8, %v1121_v7 }
 0x944   :  { %v1134_v13 = vsub.f32 %v1115_v63, %v1132_v12  ;;  %v1485_v63 = vld [vmem:[%s2160_s14] ss:$0 sm:$0xff]  ;;  %s1584_s14 = smov [#allocation4]  }
 0x945   :  { %s1338_s15 = sshll.u32 %s1584_s14, 4  ;;  %s1339_s15 = int_to_ptr.vmem [resolvable:$true] %s1338_s15 }
 0x946   :  { %v1136_v14 = vmul.f32 %v1134_v13, %v1134_v13  ;;  %1346 = dma.vmem_to_hbm [thread:$0]  %s1339_s15, 256, %s1341_s21, [#allocation5], %s1585_s1, %s1585_s1, %s1586_s22  }
 0x948   :  { %v1138_v10 = vsel %vm80_vm0, %v1136_v14, 0.0 }
 0x949   :  { %1139 = vadd.xlane.f32.xlu0 %v1138_v10 }
 0x94b   :  { %v1124_v15 = vpop.xlane.xlu2 %1123 }
 0x94c   :  { %v1133_v16 = vmul.f32 %v2060_v8, %v1124_v15 }
 0x94e   :  { %v1135_v18 = vsub.f32 %v1116_v0, %v1133_v16 }
 0x950   :  { %v1137_v20 = vmul.f32 %v1135_v18, %v1135_v18 }
 0x952   :  { %v1141_v21 = vsel %vm80_vm0, %v1137_v20, 0.0 }
 0x953   :  { %1142 = vadd.xlane.f32.xlu1 %v1141_v21 }
 0x9bc   :  { %v1140_v17 = vpop.xlane.xlu0 %1139 }
 0x9bd   :  { %v1144_v19 = vmul.f32 %v1140_v17, %v2060_v8 }
 0x9bf   :  { %v1146_v26 = vadd.f32 1e-05, %v1144_v19 }
 0x9c1   :  { %1523 = vrsqrt.f32 %v1146_v26  ;;  %vm1154_vm4 = vweird.f32 %v1146_v26 }
 0x9c6   :  { %v1143_v31 = vpop.xlane.xlu1 %1142 }
 0x9c7   :  { %v1524_v32 = vpop.eup %1523  ;;  %v1145_v34 = vmul.f32 %v1143_v31, %v2060_v8 }
 0x9c8   :  { %v1149_v36 = vmul.f32 %v1524_v32, %v1146_v26  ;;  %vm1155_vm3 = vweird.f32 %v1524_v32 }
 0x9c9   :  { %v1147_v37 = vadd.f32 1e-05, %v1145_v34  ;;  %vm1156_vm5 = vmor %vm1154_vm4, %vm1155_vm3 }
 0x9ca   :  { %v1150_v39 = vmul.f32 %v1524_v32, %v1149_v36 }
 0x9cb   :  { %1525 = vrsqrt.f32 %v1147_v37  ;;  %vm1164_vm7 = vweird.f32 %v1147_v37 }
 0x9cc   :  { %v1151_v28 = vmul.f32 0.5, %v1150_v39 }
 0x9ce   :  { %v1152_v33 = vsub.f32 1.5, %v1151_v28 }
 0x9d0   :  { %v1153_v40 = vmul.f32 %v1524_v32, %v1152_v33 }
 0x9d1   :  { %v1526_v41 = vpop.eup %1525 }
 0x9d2   :  { %v1157_v43 = vsel %vm1156_vm5, %v1524_v32, %v1153_v40  ;;  %v1159_v44 = vmul.f32 %v1526_v41, %v1147_v37  ;;  %vm1165_vm6 = vweird.f32 %v1526_v41 }
 0x9d3   :  { %v1168_v45 = vmul.f32 %v1157_v43, %v1134_v13  ;;  %vm1166_vm8 = vmor %vm1164_vm7, %vm1165_vm6 }
 0x9d4   :  { %v1160_v47 = vmul.f32 %v1526_v41, %v1159_v44 }
 0x9d5   :  { %v1173_v48 = vmul.f32 %v1483_v42, %v1168_v45 }
 0x9d6   :  { %v1161_v49 = vmul.f32 0.5, %v1160_v47 }
 0x9d7   :  { %v1178_v50 = vadd.f32 %v1484_v46, %v1173_v48 }
 0x9d8   :  { %v1162_v51 = vsub.f32 1.5, %v1161_v49 }
 0x9d9   :  { %1461 = vmatmul.msk.f32.vlgmr.msrb.gmra.mxu2 %vm80_vm0, %v1178_v50 }
 0x9da   :  { %v1163_v52 = vmul.f32 %v1526_v41, %v1162_v51 }
 0x9dc   :  { %v1167_v54 = vsel %vm1166_vm8, %v1526_v41, %v1163_v52 }
 0x9dd   :  { %v1169_v55 = vmul.f32 %v1167_v54, %v1135_v18 }
 0x9df   :  { %v1174_v57 = vmul.f32 %v1483_v42, %v1169_v55 }
 0x9e1   :  { %v1179_v58 = vadd.f32 %v1484_v46, %v1174_v57 }
 0x9e3   :  { %1462 = vmatmul.msk.f32.gmra.mxu2 %vm80_vm0, %v1179_v58 }
 0xa5c   :  { %v1211_v62 = vpop.f32.mrf.mxu2 }
 0xa5d   :  { %v1212_v5 = vadd.f32 %v1485_v63, %v1211_v62 }
 0xa5f   :  { %v1217_v53 = vmax.f32 %v1212_v5, 0.0 }
 0xa61   :  { %1463 = vmatmul.msk.f32.vlgmr.msrb.gmra.mxu3 %vm1231_vm9, %v1217_v53 }
 0xa66   :  { %v1214_v56 = vpop.f32.mrf.mxu2 }
 0xa67   :  { %v1215_v0 = vadd.f32 %v1485_v63, %v1214_v56 }
 0xa69   :  { %v1218_v1 = vmax.f32 %v1215_v0, 0.0 }
 0xa6b   :  { %1464 = vmatmul.msk.f32.gmra.mxu3 %vm1231_vm9, %v1218_v1 }
 0xae4   :  { %v1255_v11 = vpop.f32.mrf.mxu3 }
 0xae5   :  { %v1256_v2 = vadd.f32 %v1486_v9, %v1255_v11 }
 0xae7   :  { %v1261_v3 = vadd.f32 %v1256_v2, %v1256_v2 }
 0xae9   :  { %v1265_v4 = vsel %vm80_vm0, %v1261_v3, 0.0 }
 0xaea   :  { %1266 = vadd.xlane.f32.xlu2 %v1265_v4 }
 0xaee   :  { %v1258_v6 = vpop.f32.mrf.mxu3 }
 0xaef   :  { %v1259_v7 = vadd.f32 %v1486_v9, %v1258_v6 }
 0xaf1   :  { %v1262_v12 = vadd.f32 %v1259_v7, %v1259_v7 }
 0xaf3   :  { %v1268_v13 = vsel %vm80_vm0, %v1262_v12, 0.0 }
 0xaf4   :  { %1269 = vadd.xlane.f32.xlu0 %v1268_v13 }
 0xb5d   :  { %v1267_v14 = vpop.xlane.xlu2 %1266 }
 0xb5e   :  { %v1271_v10 = vmul.f32 %v1267_v14, %v2060_v8 }
 0xb60   :  { %v1273_v15 = vsub.f32 %v1261_v3, %v1271_v10 }
 0xb62   :  { %v1275_v16 = vmul.f32 %v1273_v15, %v1273_v15 }
 0xb64   :  { %v1277_v18 = vsel %vm80_vm0, %v1275_v16, 0.0 }
 0xb65   :  { %1278 = vadd.xlane.f32.xlu1 %v1277_v18 }
 0xb67   :  { %v1270_v20 = vpop.xlane.xlu0 %1269 }
 0xb68   :  { %v1272_v21 = vmul.f32 %v1270_v20, %v2060_v8 }
 0xb6a   :  { %v1274_v22 = vsub.f32 %v1262_v12, %v1272_v21 }
 0xb6c   :  { %v1276_v23 = vmul.f32 %v1274_v22, %v1274_v22 }
 0xb6e   :  { %v1280_v24 = vsel %vm80_vm0, %v1276_v23, 0.0 }
 0xb6f   :  { %1281 = vadd.xlane.f32.xlu2 %v1280_v24 }
 0xbd8   :  { %v1279_v25 = vpop.xlane.xlu1 %1278 }
 0xbd9   :  { %v1283_v17 = vmul.f32 %v1279_v25, %v2060_v8 }
 0xbdb   :  { %v1285_v19 = vadd.f32 1e-05, %v1283_v17 }
 0xbdd   :  { %1527 = vrsqrt.f32 %v1285_v19  ;;  %vm1293_vm11 = vweird.f32 %v1285_v19 }
 0xbe2   :  { %v1282_v26 = vpop.xlane.xlu2 %1281 }
 0xbe3   :  { %v1528_v27 = vpop.eup %1527  ;;  %v1284_v29 = vmul.f32 %v1282_v26, %v2060_v8  ;;  %v1488_v8 = vld [vmem:[%s2164_s18] ss:$0 sm:$0xff] }
 0xbe4   :  { %v1288_v30 = vmul.f32 %v1528_v27, %v1285_v19  ;;  %vm1294_vm10 = vweird.f32 %v1528_v27 }
 0xbe5   :  { %v1286_v31 = vadd.f32 1e-05, %v1284_v29  ;;  %vm1295_vm12 = vmor %vm1293_vm11, %vm1294_vm10 }
 0xbe6   :  { %v1289_v32 = vmul.f32 %v1528_v27, %v1288_v30 }
 0xbe7   :  { %1529 = vrsqrt.f32 %v1286_v31  ;;  %vm1303_vm14 = vweird.f32 %v1286_v31 }
 0xbe8   :  { %v1290_v34 = vmul.f32 0.5, %v1289_v32 }
 0xbea   :  { %v1291_v35 = vsub.f32 1.5, %v1290_v34 }
 0xbec   :  { %v1292_v36 = vmul.f32 %v1528_v27, %v1291_v35 }
 0xbed   :  { %v1530_v37 = vpop.eup %1529 }
 0xbee   :  { %v1296_v39 = vsel %vm1295_vm12, %v1528_v27, %v1292_v36  ;;  %v1298_v28 = vmul.f32 %v1530_v37, %v1286_v31  ;;  %vm1304_vm13 = vweird.f32 %v1530_v37 }
 0xbef   :  { %v1307_v33 = vmul.f32 %v1296_v39, %v1273_v15  ;;  %vm1305_vm15 = vmor %vm1303_vm14, %vm1304_vm13 }
 0xbf0   :  { %v1299_v40 = vmul.f32 %v1530_v37, %v1298_v28 }
 0xbf1   :  { %v1312_v41 = vmul.f32 %v1487_v38, %v1307_v33 }
 0xbf2   :  { %v1300_v42 = vmul.f32 0.5, %v1299_v40 }
 0xbf3   :  { %v1317_v43 = vadd.f32 %v1488_v8, %v1312_v41 }
 0xbf4   :  { %v1301_v44 = vsub.f32 1.5, %v1300_v42 }
 0xbf5   :  { %1319 = vst.msk [vmem:[#allocation2] sm:$0xff] %vm80_vm0, %v1317_v43 }
 0xbf6   :  { %v1302_v45 = vmul.f32 %v1530_v37, %v1301_v44 }
 0xbf8   :  { %v1306_v46 = vsel %vm1305_vm15, %v1530_v37, %v1302_v45 }
 0xbf9   :  { %v1308_v47 = vmul.f32 %v1306_v46, %v1274_v22 }
 0xbfb   :  { %v1313_v48 = vmul.f32 %v1487_v38, %v1308_v47 }
 0xbfd   :  { %v1318_v49 = vadd.f32 %v1488_v8, %v1313_v48 }
 0xbff   :  { %1320 = vst.msk [vmem:[#allocation2 + $0x8] sm:$0xff] %vm80_vm0, %v1318_v49 }
 0xc00   :  { %1333 = dma.vmem_to_hbm [thread:$0]  %s1326_s3, 256, %s1328_s8, [#allocation3], %s1585_s1, %s1585_s1, %s1586_s22  }
 0xc01   :  { %1579 = dma.done.wait [#allocation3], 256  }
 0xc02   :  { %1580 = vsyncadd [#allocation3], 4294967040 }
 0xc03   :  { %1581 = dma.done.wait [#allocation5], 256  }
 0xc04   :  { %1582 = vsyncadd [#allocation5], 4294967040 }
 0xc05   :  { %1355 = vsyncpa [#allocation3], 1 }
 0xc06   :  { %1356 = vsyncpa [#allocation5], 1 }

</bundles_post_ra>
